<compile_context>
chip_gen: v6e
topology: v6e:2x2x1
jax: 0.10.0
libtpu: 0.0.40
codegen_flags: <defaults>
</compile_context>

<pallas_src>
import functools

import jax
import jax.numpy as jnp
import numpy as np
from jax import lax
from jax.experimental import pallas as pl
from jax.experimental.pallas import tpu as pltpu


# ----------------------------- fused kernel -------------------------------- #
def _down_fused_kernel(x_ref, w1_ref, b1_ref, w2_ref, b2_ref, o_ref,
                       pad1_ref, im1_ref, pad2_ref, im2_ref,
                       *, f, pad, negative_slope):
    # x_ref   : (Hh, 2, Wh, 2, Cin)   one image, W/H pre-split for the 2x2 pool
    # w1_ref  : (f*f*Cin,  Cout)      conv1 weights, im2col-flattened (kh,kw,cin major->minor)
    # w2_ref  : (f*f*Cout, Cout)      conv2 weights, same layout
    # b*_ref  : (1, Cout)
    # o_ref   : (1, Hh, Wh, Cout)
    # pad*_ref: VMEM (Hh+2p, Wh+2p, C)     zero-padded conv inputs
    # im*_ref : VMEM (Hh*Wh, f*f*C)        im2col matrices
    Hh, _, Wh, _, Cin = x_ref.shape
    Cout = w1_ref.shape[1]

    # ---- avg_pool2d(kernel=2, stride=2) ------------------------------------
    pooled = (x_ref[:, 0, :, 0, :] + x_ref[:, 0, :, 1, :]
              + x_ref[:, 1, :, 0, :] + x_ref[:, 1, :, 1, :]) * 0.25   # (Hh, Wh, Cin)

    # ---- 'same' conv + bias + leaky_relu, as one im2col matmul -------------
    def conv_lrelu(inp, pad_ref, im_ref, w_ref, b_ref):
        cin = inp.shape[-1]
        # zero-pad entirely in VMEM (no HBM round trip)
        pad_ref[...] = jnp.zeros_like(pad_ref)
        pad_ref[pad:pad + Hh, pad:pad + Wh, :] = inp
        # build im2col matrix: K = f*f*cin columns
        for kh in range(f):
            for kw in range(f):
                c0 = (kh * f + kw) * cin
                im_ref[:, c0:c0 + cin] = (
                    pad_ref[kh:kh + Hh, kw:kw + Wh, :].reshape(Hh * Wh, cin))
        # single MXU matmul, f32 accumulate; bias added once
        acc = jnp.dot(im_ref[...], w_ref[...],
                      preferred_element_type=jnp.float32)
        acc = acc + b_ref[...]
        return jnp.where(acc > 0, acc, negative_slope * acc)          # (Hh*Wh, Cout)

    h1 = conv_lrelu(pooled, pad1_ref, im1_ref, w1_ref, b1_ref)
    h2 = conv_lrelu(h1.reshape(Hh, Wh, Cout), pad2_ref, im2_ref, w2_ref, b2_ref)

    o_ref[...] = h2.reshape(1, Hh, Wh, Cout).astype(o_ref.dtype)


# ------------------------------ module wrapper ----------------------------- #
def down_forward(x_nchw, w1_oihw, b1, w2_oihw, b2, filter_size):
    f = int(filter_size)
    pad = (f - 1) // 2
    N, Cin, H, W = x_nchw.shape
    assert H % 2 == 0 and W % 2 == 0, "avg_pool2d(2) requires even H, W"
    assert f % 2 == 1, "filterSize must be odd for symmetric 'same' padding"
    Cout = w1_oihw.shape[0]
    Hh, Wh = H // 2, W // 2
    Hp, Wp = Hh + 2 * pad, Wh + 2 * pad

    # One-off layout glue (tiny tensors): NCHW -> NHWC activations; OIHW -> HWIO
    # -> im2col-flattened (f*f*Cin, Cout) weights matching the kernel's column order.
    x = jnp.transpose(x_nchw, (0, 2, 3, 1)).reshape(N * Hh, 2, Wh, 2, Cin)
    w1 = jnp.transpose(w1_oihw, (2, 3, 1, 0)).reshape(f * f * Cin, Cout)
    w2 = jnp.transpose(w2_oihw, (2, 3, 1, 0)).reshape(f * f * Cout, Cout)
    b1r = b1.reshape(1, Cout)
    b2r = b2.reshape(1, Cout)

    kernel = functools.partial(_down_fused_kernel, f=f, pad=pad,
                               negative_slope=0.1)
    out = pl.pallas_call(
        kernel,
        out_shape=jax.ShapeDtypeStruct((N, Hh, Wh, Cout), x_nchw.dtype),
        grid=(N,),
        in_specs=[
            pl.BlockSpec((Hh, 2, Wh, 2, Cin), lambda n: (n, 0, 0, 0, 0)),
            pl.BlockSpec((f * f * Cin, Cout), lambda n: (0, 0)),
            pl.BlockSpec((1, Cout), lambda n: (0, 0)),
            pl.BlockSpec((f * f * Cout, Cout), lambda n: (0, 0)),
            pl.BlockSpec((1, Cout), lambda n: (0, 0)),
        ],
        out_specs=pl.BlockSpec((1, Hh, Wh, Cout), lambda n: (n, 0, 0, 0)),
        scratch_shapes=[
            pltpu.VMEM((Hp, Wp, Cin), jnp.float32),            # padded conv1 input
            pltpu.VMEM((Hh * Wh, f * f * Cin), jnp.float32),   # im2col for conv1
            pltpu.VMEM((Hp, Wp, Cout), jnp.float32),           # padded conv2 input
            pltpu.VMEM((Hh * Wh, f * f * Cout), jnp.float32),  # im2col for conv2
        ],
        compiler_params=pltpu.CompilerParams(
            dimension_semantics=("parallel",)),                # batch axis -> both v7x TCs
    )(x, w1, b1r, w2, b2r)
    return jnp.transpose(out, (0, 3, 1, 2))                    # NHWC -> NCHW


# --------------------------- pure-JAX reference ---------------------------- #
def _reference(x, w1, b1, w2, b2, pad):
    N, C, H, W = x.shape
    xp = x.reshape(N, C, H // 2, 2, W // 2, 2).mean(axis=(3, 5))

    def conv(y, w, b):
        out = lax.conv_general_dilated(
            y, w, window_strides=(1, 1), padding=[(pad, pad), (pad, pad)],
            dimension_numbers=("NCHW", "OIHW", "NCHW"))
        out = out + b[None, :, None, None]
        return jnp.where(out > 0, out, 0.1 * out)

    return conv(conv(xp, w1, b1), w2, b2)


if __name__ == "__main__":
    key = jax.random.PRNGKey(0)
    k0, k1, k2, k3, k4 = jax.random.split(key, 5)
    N, Cin, Cout, f, S = 2, 4, 8, 3, 16     # down(inChannels=4, outChannels=8, filterSize=3)

    x = jax.random.normal(k0, (N, Cin, S, S), jnp.float32)
    w1 = 0.1 * jax.random.normal(k1, (Cout, Cin, f, f), jnp.float32)   # conv1.weight (OIHW)
    b1 = 0.1 * jax.random.normal(k2, (Cout,), jnp.float32)             # conv1.bias
    w2 = 0.1 * jax.random.normal(k3, (Cout, Cout, f, f), jnp.float32)  # conv2.weight (OIHW)
    b2 = 0.1 * jax.random.normal(k4, (Cout,), jnp.float32)             # conv2.bias

    out = down_forward(x, w1, b1, w2, b2, f)
    out = jax.block_until_ready(out)

    ref = _reference(x, w1, b1, w2, b2, (f - 1) // 2)
    np.testing.assert_allclose(np.asarray(out), np.asarray(ref), rtol=1e-4, atol=1e-4)
    print("KERNEL_OK")
</pallas_src>

<mosaic_0001>
module attributes {stable_mosaic.version = 11 : i64} {
  func.func @_down_fused_kernel(%arg0: i32, %arg1: memref<8x2x8x2x4xf32, #tpu.memory_space<vmem>>, %arg2: memref<36x8xf32, #tpu.memory_space<vmem>>, %arg3: memref<1x8xf32, #tpu.memory_space<vmem>>, %arg4: memref<72x8xf32, #tpu.memory_space<vmem>>, %arg5: memref<1x8xf32, #tpu.memory_space<vmem>>, %arg6: memref<1x8x8x8xf32, #tpu.memory_space<vmem>>, %arg7: memref<10x10x4xf32, #tpu.memory_space<vmem>>, %arg8: memref<64x36xf32, #tpu.memory_space<vmem>>, %arg9: memref<10x10x8xf32, #tpu.memory_space<vmem>>, %arg10: memref<64x72xf32, #tpu.memory_space<vmem>>) attributes {dimension_semantics = [#tpu.dimension_semantics<parallel>], iteration_bounds = array<i64: 2>, scalar_prefetch = 0 : i64, scratch_operands = 4 : i64, tpu.core_type = #tpu.core_type<tc>, window_params = [{transform_indices = @transform_0, window_bounds = array<i64: 8, 2, 8, 2, 4>}, {pipeline_mode = #tpu.pipeline_mode<synchronous>, transform_indices = @transform_1, window_bounds = array<i64: 36, 8>}, {pipeline_mode = #tpu.pipeline_mode<synchronous>, transform_indices = @transform_2, window_bounds = array<i64: 1, 8>}, {pipeline_mode = #tpu.pipeline_mode<synchronous>, transform_indices = @transform_3, window_bounds = array<i64: 72, 8>}, {pipeline_mode = #tpu.pipeline_mode<synchronous>, transform_indices = @transform_4, window_bounds = array<i64: 1, 8>}, {transform_indices = @transform_5, window_bounds = array<i64: 1, 8, 8, 8>}]} {
    %c0 = arith.constant 0 : index
    %c0_0 = arith.constant 0 : index
    %c0_1 = arith.constant 0 : index
    %c0_2 = arith.constant 0 : index
    %c0_3 = arith.constant 0 : index
    %0 = vector.load %arg1[%c0, %c0_0, %c0_1, %c0_2, %c0_3] : memref<8x2x8x2x4xf32, #tpu.memory_space<vmem>>, vector<8x1x8x1x4xf32>
    %1 = vector.shape_cast %0 : vector<8x1x8x1x4xf32> to vector<8x8x4xf32>
    %c0_4 = arith.constant 0 : index
    %c0_5 = arith.constant 0 : index
    %c0_6 = arith.constant 0 : index
    %c1 = arith.constant 1 : index
    %c0_7 = arith.constant 0 : index
    %2 = vector.load %arg1[%c0_4, %c0_5, %c0_6, %c1, %c0_7] : memref<8x2x8x2x4xf32, #tpu.memory_space<vmem>>, vector<8x1x8x1x4xf32>
    %3 = vector.shape_cast %2 : vector<8x1x8x1x4xf32> to vector<8x8x4xf32>
    %4 = arith.addf %1, %3 : vector<8x8x4xf32>
    %c0_8 = arith.constant 0 : index
    %c1_9 = arith.constant 1 : index
    %c0_10 = arith.constant 0 : index
    %c0_11 = arith.constant 0 : index
    %c0_12 = arith.constant 0 : index
    %5 = vector.load %arg1[%c0_8, %c1_9, %c0_10, %c0_11, %c0_12] : memref<8x2x8x2x4xf32, #tpu.memory_space<vmem>>, vector<8x1x8x1x4xf32>
    %6 = vector.shape_cast %5 : vector<8x1x8x1x4xf32> to vector<8x8x4xf32>
    %7 = arith.addf %4, %6 : vector<8x8x4xf32>
    %c0_13 = arith.constant 0 : index
    %c1_14 = arith.constant 1 : index
    %c0_15 = arith.constant 0 : index
    %c1_16 = arith.constant 1 : index
    %c0_17 = arith.constant 0 : index
    %8 = vector.load %arg1[%c0_13, %c1_14, %c0_15, %c1_16, %c0_17] : memref<8x2x8x2x4xf32, #tpu.memory_space<vmem>>, vector<8x1x8x1x4xf32>
    %9 = vector.shape_cast %8 : vector<8x1x8x1x4xf32> to vector<8x8x4xf32>
    %10 = arith.addf %7, %9 : vector<8x8x4xf32>
    %cst = arith.constant 2.500000e-01 : f32
    %11 = vector.broadcast %cst : f32 to vector<8x8x4xf32>
    %12 = arith.mulf %10, %11 : vector<8x8x4xf32>
    %cst_18 = arith.constant 0.000000e+00 : f32
    %13 = vector.broadcast %cst_18 : f32 to vector<10x10x4xf32>
    %c0_19 = arith.constant 0 : index
    %c0_20 = arith.constant 0 : index
    %c0_21 = arith.constant 0 : index
    %14 = vector.load %arg7[%c0_19, %c0_20, %c0_21] : memref<10x10x4xf32, #tpu.memory_space<vmem>>, vector<10x10x4xf32>
    tpu.vector_store %arg7[%c0_19, %c0_20, %c0_21], %13 {strides = array<i32>} : memref<10x10x4xf32, #tpu.memory_space<vmem>>, vector<10x10x4xf32>,
    %c1_22 = arith.constant 1 : index
    %c1_23 = arith.constant 1 : index
    %c0_24 = arith.constant 0 : index
    %15 = vector.load %arg7[%c1_22, %c1_23, %c0_24] : memref<10x10x4xf32, #tpu.memory_space<vmem>>, vector<8x8x4xf32>
    tpu.vector_store %arg7[%c1_22, %c1_23, %c0_24], %12 {strides = array<i32>} : memref<10x10x4xf32, #tpu.memory_space<vmem>>, vector<8x8x4xf32>,
    %c0_25 = arith.constant 0 : index
    %c0_26 = arith.constant 0 : index
    %c0_27 = arith.constant 0 : index
    %16 = vector.load %arg7[%c0_25, %c0_26, %c0_27] : memref<10x10x4xf32, #tpu.memory_space<vmem>>, vector<8x8x4xf32>
    %17 = vector.shape_cast %16 : vector<8x8x4xf32> to vector<64x4xf32>
    %c0_28 = arith.constant 0 : index
    %c0_29 = arith.constant 0 : index
    %18 = vector.load %arg8[%c0_28, %c0_29] : memref<64x36xf32, #tpu.memory_space<vmem>>, vector<64x4xf32>
    tpu.vector_store %arg8[%c0_28, %c0_29], %17 {strides = array<i32>} : memref<64x36xf32, #tpu.memory_space<vmem>>, vector<64x4xf32>,
    %c0_30 = arith.constant 0 : index
    %c1_31 = arith.constant 1 : index
    %c0_32 = arith.constant 0 : index
    %19 = vector.load %arg7[%c0_30, %c1_31, %c0_32] : memref<10x10x4xf32, #tpu.memory_space<vmem>>, vector<8x8x4xf32>
    %20 = vector.shape_cast %19 : vector<8x8x4xf32> to vector<64x4xf32>
    %c0_33 = arith.constant 0 : index
    %c4 = arith.constant 4 : index
    %21 = vector.load %arg8[%c0_33, %c4] : memref<64x36xf32, #tpu.memory_space<vmem>>, vector<64x4xf32>
    tpu.vector_store %arg8[%c0_33, %c4], %20 {strides = array<i32>} : memref<64x36xf32, #tpu.memory_space<vmem>>, vector<64x4xf32>,
    %c0_34 = arith.constant 0 : index
    %c2 = arith.constant 2 : index
    %c0_35 = arith.constant 0 : index
    %22 = vector.load %arg7[%c0_34, %c2, %c0_35] : memref<10x10x4xf32, #tpu.memory_space<vmem>>, vector<8x8x4xf32>
    %23 = vector.shape_cast %22 : vector<8x8x4xf32> to vector<64x4xf32>
    %c0_36 = arith.constant 0 : index
    %c8 = arith.constant 8 : index
    %24 = vector.load %arg8[%c0_36, %c8] : memref<64x36xf32, #tpu.memory_space<vmem>>, vector<64x4xf32>
    tpu.vector_store %arg8[%c0_36, %c8], %23 {strides = array<i32>} : memref<64x36xf32, #tpu.memory_space<vmem>>, vector<64x4xf32>,
    %c1_37 = arith.constant 1 : index
    %c0_38 = arith.constant 0 : index
    %c0_39 = arith.constant 0 : index
    %25 = vector.load %arg7[%c1_37, %c0_38, %c0_39] : memref<10x10x4xf32, #tpu.memory_space<vmem>>, vector<8x8x4xf32>
    %26 = vector.shape_cast %25 : vector<8x8x4xf32> to vector<64x4xf32>
    %c0_40 = arith.constant 0 : index
    %c12 = arith.constant 12 : index
    %27 = vector.load %arg8[%c0_40, %c12] : memref<64x36xf32, #tpu.memory_space<vmem>>, vector<64x4xf32>
    tpu.vector_store %arg8[%c0_40, %c12], %26 {strides = array<i32>} : memref<64x36xf32, #tpu.memory_space<vmem>>, vector<64x4xf32>,
    %c1_41 = arith.constant 1 : index
    %c1_42 = arith.constant 1 : index
    %c0_43 = arith.constant 0 : index
    %28 = vector.load %arg7[%c1_41, %c1_42, %c0_43] : memref<10x10x4xf32, #tpu.memory_space<vmem>>, vector<8x8x4xf32>
    %29 = vector.shape_cast %28 : vector<8x8x4xf32> to vector<64x4xf32>
    %c0_44 = arith.constant 0 : index
    %c16 = arith.constant 16 : index
    %30 = vector.load %arg8[%c0_44, %c16] : memref<64x36xf32, #tpu.memory_space<vmem>>, vector<64x4xf32>
    tpu.vector_store %arg8[%c0_44, %c16], %29 {strides = array<i32>} : memref<64x36xf32, #tpu.memory_space<vmem>>, vector<64x4xf32>,
    %c1_45 = arith.constant 1 : index
    %c2_46 = arith.constant 2 : index
    %c0_47 = arith.constant 0 : index
    %31 = vector.load %arg7[%c1_45, %c2_46, %c0_47] : memref<10x10x4xf32, #tpu.memory_space<vmem>>, vector<8x8x4xf32>
    %32 = vector.shape_cast %31 : vector<8x8x4xf32> to vector<64x4xf32>
    %c0_48 = arith.constant 0 : index
    %c20 = arith.constant 20 : index
    %33 = vector.load %arg8[%c0_48, %c20] : memref<64x36xf32, #tpu.memory_space<vmem>>, vector<64x4xf32>
    tpu.vector_store %arg8[%c0_48, %c20], %32 {strides = array<i32>} : memref<64x36xf32, #tpu.memory_space<vmem>>, vector<64x4xf32>,
    %c2_49 = arith.constant 2 : index
    %c0_50 = arith.constant 0 : index
    %c0_51 = arith.constant 0 : index
    %34 = vector.load %arg7[%c2_49, %c0_50, %c0_51] : memref<10x10x4xf32, #tpu.memory_space<vmem>>, vector<8x8x4xf32>
    %35 = vector.shape_cast %34 : vector<8x8x4xf32> to vector<64x4xf32>
    %c0_52 = arith.constant 0 : index
    %c24 = arith.constant 24 : index
    %36 = vector.load %arg8[%c0_52, %c24] : memref<64x36xf32, #tpu.memory_space<vmem>>, vector<64x4xf32>
    tpu.vector_store %arg8[%c0_52, %c24], %35 {strides = array<i32>} : memref<64x36xf32, #tpu.memory_space<vmem>>, vector<64x4xf32>,
    %c2_53 = arith.constant 2 : index
    %c1_54 = arith.constant 1 : index
    %c0_55 = arith.constant 0 : index
    %37 = vector.load %arg7[%c2_53, %c1_54, %c0_55] : memref<10x10x4xf32, #tpu.memory_space<vmem>>, vector<8x8x4xf32>
    %38 = vector.shape_cast %37 : vector<8x8x4xf32> to vector<64x4xf32>
    %c0_56 = arith.constant 0 : index
    %c28 = arith.constant 28 : index
    %39 = vector.load %arg8[%c0_56, %c28] : memref<64x36xf32, #tpu.memory_space<vmem>>, vector<64x4xf32>
    tpu.vector_store %arg8[%c0_56, %c28], %38 {strides = array<i32>} : memref<64x36xf32, #tpu.memory_space<vmem>>, vector<64x4xf32>,
    %c2_57 = arith.constant 2 : index
    %c2_58 = arith.constant 2 : index
    %c0_59 = arith.constant 0 : index
    %40 = vector.load %arg7[%c2_57, %c2_58, %c0_59] : memref<10x10x4xf32, #tpu.memory_space<vmem>>, vector<8x8x4xf32>
    %41 = vector.shape_cast %40 : vector<8x8x4xf32> to vector<64x4xf32>
    %c0_60 = arith.constant 0 : index
    %c32 = arith.constant 32 : index
    %42 = vector.load %arg8[%c0_60, %c32] : memref<64x36xf32, #tpu.memory_space<vmem>>, vector<64x4xf32>
    tpu.vector_store %arg8[%c0_60, %c32], %41 {strides = array<i32>} : memref<64x36xf32, #tpu.memory_space<vmem>>, vector<64x4xf32>,
    %c0_61 = arith.constant 0 : index
    %c0_62 = arith.constant 0 : index
    %43 = vector.load %arg8[%c0_61, %c0_62] : memref<64x36xf32, #tpu.memory_space<vmem>>, vector<64x36xf32>
    %c0_63 = arith.constant 0 : index
    %c0_64 = arith.constant 0 : index
    %44 = vector.load %arg2[%c0_63, %c0_64] : memref<36x8xf32, #tpu.memory_space<vmem>>, vector<36x8xf32>
    %cst_65 = arith.constant dense<0.000000e+00> : vector<64x8xf32>
    %45 = tpu.matmul %43, %44, %cst_65 {dimension_numbers = #tpu.dot_dimension_numbers<[1], [0], [0], [1], [0, 0, 1, 1], [], []>} : vector<64x36xf32>, vector<36x8xf32>, vector<64x8xf32> -> vector<64x8xf32>
    %c0_66 = arith.constant 0 : index
    %c0_67 = arith.constant 0 : index
    %46 = vector.load %arg3[%c0_66, %c0_67] : memref<1x8xf32, #tpu.memory_space<vmem>>, vector<1x8xf32>
    %47 = vector.broadcast %46 : vector<1x8xf32> to vector<64x8xf32>
    %48 = arith.addf %45, %47 : vector<64x8xf32>
    %cst_68 = arith.constant 0.000000e+00 : f32
    %49 = vector.broadcast %cst_68 : f32 to vector<64x8xf32>
    %50 = arith.cmpf ogt, %48, %49 : vector<64x8xf32>
    %cst_69 = arith.constant 1.000000e-01 : f32
    %51 = vector.broadcast %cst_69 : f32 to vector<64x8xf32>
    %52 = arith.mulf %51, %48 : vector<64x8xf32>
    %53 = arith.select %50, %48, %52 : vector<64x8xi1>, vector<64x8xf32>
    %54 = vector.shape_cast %53 : vector<64x8xf32> to vector<8x8x8xf32>
    %cst_70 = arith.constant 0.000000e+00 : f32
    %55 = vector.broadcast %cst_70 : f32 to vector<10x10x8xf32>
    %c0_71 = arith.constant 0 : index
    %c0_72 = arith.constant 0 : index
    %c0_73 = arith.constant 0 : index
    %56 = vector.load %arg9[%c0_71, %c0_72, %c0_73] : memref<10x10x8xf32, #tpu.memory_space<vmem>>, vector<10x10x8xf32>
    tpu.vector_store %arg9[%c0_71, %c0_72, %c0_73], %55 {strides = array<i32>} : memref<10x10x8xf32, #tpu.memory_space<vmem>>, vector<10x10x8xf32>,
    %c1_74 = arith.constant 1 : index
    %c1_75 = arith.constant 1 : index
    %c0_76 = arith.constant 0 : index
    %57 = vector.load %arg9[%c1_74, %c1_75, %c0_76] : memref<10x10x8xf32, #tpu.memory_space<vmem>>, vector<8x8x8xf32>
    tpu.vector_store %arg9[%c1_74, %c1_75, %c0_76], %54 {strides = array<i32>} : memref<10x10x8xf32, #tpu.memory_space<vmem>>, vector<8x8x8xf32>,
    %c0_77 = arith.constant 0 : index
    %c0_78 = arith.constant 0 : index
    %c0_79 = arith.constant 0 : index
    %58 = vector.load %arg9[%c0_77, %c0_78, %c0_79] : memref<10x10x8xf32, #tpu.memory_space<vmem>>, vector<8x8x8xf32>
    %59 = vector.shape_cast %58 : vector<8x8x8xf32> to vector<64x8xf32>
    %c0_80 = arith.constant 0 : index
    %c0_81 = arith.constant 0 : index
    %60 = vector.load %arg10[%c0_80, %c0_81] : memref<64x72xf32, #tpu.memory_space<vmem>>, vector<64x8xf32>
    tpu.vector_store %arg10[%c0_80, %c0_81], %59 {strides = array<i32>} : memref<64x72xf32, #tpu.memory_space<vmem>>, vector<64x8xf32>,
    %c0_82 = arith.constant 0 : index
    %c1_83 = arith.constant 1 : index
    %c0_84 = arith.constant 0 : index
    %61 = vector.load %arg9[%c0_82, %c1_83, %c0_84] : memref<10x10x8xf32, #tpu.memory_space<vmem>>, vector<8x8x8xf32>
    %62 = vector.shape_cast %61 : vector<8x8x8xf32> to vector<64x8xf32>
    %c0_85 = arith.constant 0 : index
    %c8_86 = arith.constant 8 : index
    %63 = vector.load %arg10[%c0_85, %c8_86] : memref<64x72xf32, #tpu.memory_space<vmem>>, vector<64x8xf32>
    tpu.vector_store %arg10[%c0_85, %c8_86], %62 {strides = array<i32>} : memref<64x72xf32, #tpu.memory_space<vmem>>, vector<64x8xf32>,
    %c0_87 = arith.constant 0 : index
    %c2_88 = arith.constant 2 : index
    %c0_89 = arith.constant 0 : index
    %64 = vector.load %arg9[%c0_87, %c2_88, %c0_89] : memref<10x10x8xf32, #tpu.memory_space<vmem>>, vector<8x8x8xf32>
    %65 = vector.shape_cast %64 : vector<8x8x8xf32> to vector<64x8xf32>
    %c0_90 = arith.constant 0 : index
    %c16_91 = arith.constant 16 : index
    %66 = vector.load %arg10[%c0_90, %c16_91] : memref<64x72xf32, #tpu.memory_space<vmem>>, vector<64x8xf32>
    tpu.vector_store %arg10[%c0_90, %c16_91], %65 {strides = array<i32>} : memref<64x72xf32, #tpu.memory_space<vmem>>, vector<64x8xf32>,
    %c1_92 = arith.constant 1 : index
    %c0_93 = arith.constant 0 : index
    %c0_94 = arith.constant 0 : index
    %67 = vector.load %arg9[%c1_92, %c0_93, %c0_94] : memref<10x10x8xf32, #tpu.memory_space<vmem>>, vector<8x8x8xf32>
    %68 = vector.shape_cast %67 : vector<8x8x8xf32> to vector<64x8xf32>
    %c0_95 = arith.constant 0 : index
    %c24_96 = arith.constant 24 : index
    %69 = vector.load %arg10[%c0_95, %c24_96] : memref<64x72xf32, #tpu.memory_space<vmem>>, vector<64x8xf32>
    tpu.vector_store %arg10[%c0_95, %c24_96], %68 {strides = array<i32>} : memref<64x72xf32, #tpu.memory_space<vmem>>, vector<64x8xf32>,
    %c1_97 = arith.constant 1 : index
    %c1_98 = arith.constant 1 : index
    %c0_99 = arith.constant 0 : index
    %70 = vector.load %arg9[%c1_97, %c1_98, %c0_99] : memref<10x10x8xf32, #tpu.memory_space<vmem>>, vector<8x8x8xf32>
    %71 = vector.shape_cast %70 : vector<8x8x8xf32> to vector<64x8xf32>
    %c0_100 = arith.constant 0 : index
    %c32_101 = arith.constant 32 : index
    %72 = vector.load %arg10[%c0_100, %c32_101] : memref<64x72xf32, #tpu.memory_space<vmem>>, vector<64x8xf32>
    tpu.vector_store %arg10[%c0_100, %c32_101], %71 {strides = array<i32>} : memref<64x72xf32, #tpu.memory_space<vmem>>, vector<64x8xf32>,
    %c1_102 = arith.constant 1 : index
    %c2_103 = arith.constant 2 : index
    %c0_104 = arith.constant 0 : index
    %73 = vector.load %arg9[%c1_102, %c2_103, %c0_104] : memref<10x10x8xf32, #tpu.memory_space<vmem>>, vector<8x8x8xf32>
    %74 = vector.shape_cast %73 : vector<8x8x8xf32> to vector<64x8xf32>
    %c0_105 = arith.constant 0 : index
    %c40 = arith.constant 40 : index
    %75 = vector.load %arg10[%c0_105, %c40] : memref<64x72xf32, #tpu.memory_space<vmem>>, vector<64x8xf32>
    tpu.vector_store %arg10[%c0_105, %c40], %74 {strides = array<i32>} : memref<64x72xf32, #tpu.memory_space<vmem>>, vector<64x8xf32>,
    %c2_106 = arith.constant 2 : index
    %c0_107 = arith.constant 0 : index
    %c0_108 = arith.constant 0 : index
    %76 = vector.load %arg9[%c2_106, %c0_107, %c0_108] : memref<10x10x8xf32, #tpu.memory_space<vmem>>, vector<8x8x8xf32>
    %77 = vector.shape_cast %76 : vector<8x8x8xf32> to vector<64x8xf32>
    %c0_109 = arith.constant 0 : index
    %c48 = arith.constant 48 : index
    %78 = vector.load %arg10[%c0_109, %c48] : memref<64x72xf32, #tpu.memory_space<vmem>>, vector<64x8xf32>
    tpu.vector_store %arg10[%c0_109, %c48], %77 {strides = array<i32>} : memref<64x72xf32, #tpu.memory_space<vmem>>, vector<64x8xf32>,
    %c2_110 = arith.constant 2 : index
    %c1_111 = arith.constant 1 : index
    %c0_112 = arith.constant 0 : index
    %79 = vector.load %arg9[%c2_110, %c1_111, %c0_112] : memref<10x10x8xf32, #tpu.memory_space<vmem>>, vector<8x8x8xf32>
    %80 = vector.shape_cast %79 : vector<8x8x8xf32> to vector<64x8xf32>
    %c0_113 = arith.constant 0 : index
    %c56 = arith.constant 56 : index
    %81 = vector.load %arg10[%c0_113, %c56] : memref<64x72xf32, #tpu.memory_space<vmem>>, vector<64x8xf32>
    tpu.vector_store %arg10[%c0_113, %c56], %80 {strides = array<i32>} : memref<64x72xf32, #tpu.memory_space<vmem>>, vector<64x8xf32>,
    %c2_114 = arith.constant 2 : index
    %c2_115 = arith.constant 2 : index
    %c0_116 = arith.constant 0 : index
    %82 = vector.load %arg9[%c2_114, %c2_115, %c0_116] : memref<10x10x8xf32, #tpu.memory_space<vmem>>, vector<8x8x8xf32>
    %83 = vector.shape_cast %82 : vector<8x8x8xf32> to vector<64x8xf32>
    %c0_117 = arith.constant 0 : index
    %c64 = arith.constant 64 : index
    %84 = vector.load %arg10[%c0_117, %c64] : memref<64x72xf32, #tpu.memory_space<vmem>>, vector<64x8xf32>
    tpu.vector_store %arg10[%c0_117, %c64], %83 {strides = array<i32>} : memref<64x72xf32, #tpu.memory_space<vmem>>, vector<64x8xf32>,
    %c0_118 = arith.constant 0 : index
    %c0_119 = arith.constant 0 : index
    %85 = vector.load %arg10[%c0_118, %c0_119] : memref<64x72xf32, #tpu.memory_space<vmem>>, vector<64x72xf32>
    %c0_120 = arith.constant 0 : index
    %c0_121 = arith.constant 0 : index
    %86 = vector.load %arg4[%c0_120, %c0_121] : memref<72x8xf32, #tpu.memory_space<vmem>>, vector<72x8xf32>
    %cst_122 = arith.constant dense<0.000000e+00> : vector<64x8xf32>
    %87 = tpu.matmul %85, %86, %cst_122 {dimension_numbers = #tpu.dot_dimension_numbers<[1], [0], [0], [1], [0, 0, 1, 1], [], []>} : vector<64x72xf32>, vector<72x8xf32>, vector<64x8xf32> -> vector<64x8xf32>
    %c0_123 = arith.constant 0 : index
    %c0_124 = arith.constant 0 : index
    %88 = vector.load %arg5[%c0_123, %c0_124] : memref<1x8xf32, #tpu.memory_space<vmem>>, vector<1x8xf32>
    %89 = vector.broadcast %88 : vector<1x8xf32> to vector<64x8xf32>
    %90 = arith.addf %87, %89 : vector<64x8xf32>
    %cst_125 = arith.constant 0.000000e+00 : f32
    %91 = vector.broadcast %cst_125 : f32 to vector<64x8xf32>
    %92 = arith.cmpf ogt, %90, %91 : vector<64x8xf32>
    %cst_126 = arith.constant 1.000000e-01 : f32
    %93 = vector.broadcast %cst_126 : f32 to vector<64x8xf32>
    %94 = arith.mulf %93, %90 : vector<64x8xf32>
    %95 = arith.select %92, %90, %94 : vector<64x8xi1>, vector<64x8xf32>
    %96 = vector.shape_cast %95 : vector<64x8xf32> to vector<1x8x8x8xf32>
    %c0_127 = arith.constant 0 : index
    %c0_128 = arith.constant 0 : index
    %c0_129 = arith.constant 0 : index
    %c0_130 = arith.constant 0 : index
    %97 = vector.load %arg6[%c0_127, %c0_128, %c0_129, %c0_130] : memref<1x8x8x8xf32, #tpu.memory_space<vmem>>, vector<1x8x8x8xf32>
    tpu.vector_store %arg6[%c0_127, %c0_128, %c0_129, %c0_130], %96 {strides = array<i32>} : memref<1x8x8x8xf32, #tpu.memory_space<vmem>>, vector<1x8x8x8xf32>,
    return
  }
  func.func @transform_0(%arg0: i32) -> (i32, i32, i32, i32, i32) {
    %c0_i32 = arith.constant 0 : i32
    %c0_i32_0 = arith.constant 0 : i32
    %c0_i32_1 = arith.constant 0 : i32
    %c0_i32_2 = arith.constant 0 : i32
    %c0_i32_3 = arith.constant 0 : i32
    return %arg0, %c0_i32, %c0_i32_0, %c0_i32_1, %c0_i32_2 : i32, i32, i32, i32, i32
  }
  func.func @transform_1(%arg0: i32) -> (i32, i32) {
    %c0_i32 = arith.constant 0 : i32
    %c0_i32_0 = arith.constant 0 : i32
    %c0_i32_1 = arith.constant 0 : i32
    return %c0_i32, %c0_i32_0 : i32, i32
  }
  func.func @transform_2(%arg0: i32) -> (i32, i32) {
    %c0_i32 = arith.constant 0 : i32
    %c0_i32_0 = arith.constant 0 : i32
    %c0_i32_1 = arith.constant 0 : i32
    return %c0_i32, %c0_i32_0 : i32, i32
  }
  func.func @transform_3(%arg0: i32) -> (i32, i32) {
    %c0_i32 = arith.constant 0 : i32
    %c0_i32_0 = arith.constant 0 : i32
    %c0_i32_1 = arith.constant 0 : i32
    return %c0_i32, %c0_i32_0 : i32, i32
  }
  func.func @transform_4(%arg0: i32) -> (i32, i32) {
    %c0_i32 = arith.constant 0 : i32
    %c0_i32_0 = arith.constant 0 : i32
    %c0_i32_1 = arith.constant 0 : i32
    return %c0_i32, %c0_i32_0 : i32, i32
  }
  func.func @transform_5(%arg0: i32) -> (i32, i32, i32, i32) {
    %c0_i32 = arith.constant 0 : i32
    %c0_i32_0 = arith.constant 0 : i32
    %c0_i32_1 = arith.constant 0 : i32
    %c0_i32_2 = arith.constant 0 : i32
    return %arg0, %c0_i32, %c0_i32_0, %c0_i32_1 : i32, i32, i32, i32
  }
}

</mosaic_0001>

<bundles_post_ra>
// kernel: tpu_custom_call.1
= control target key start
LH: loop header
LB: loop body
LE: loop exit
PB: predicated region body
PF: predicated region fallthrough
CT: control target
= control target key end

     0   :  { %10 = vsyncpa [#allocation7], 0  ;;  %s3617_s0 = inlined_call_operand.vmem [shape: f32[16,2,8,2,4], index: 0, kind: input, shape index: {}]   ;;  %s3618_s1 = inlined_call_operand.vmem [shape: f32[36,8], index: 1, kind: input, shape index: {}]   ;;  %s3619_s2 = inlined_call_operand.vmem [shape: f32[1,8], index: 2, kind: input, shape index: {}]   ;;  %s3620_s3 = inlined_call_operand.vmem [shape: f32[72,8], index: 3, kind: input, shape index: {}]   ;;  %s3621_s4 = inlined_call_operand.vmem [shape: f32[1,8], index: 4, kind: input, shape index: {}]   ;;  %s3622_s5 = inlined_call_operand.hbm [shape: f32[2,8,8,8], index: 5, kind: output, shape index: {}]  }
   0x1   :  { %12 = vsyncpa [#allocation7 + $0x1], 0  ;;  %s2656_s18 = smov 0   ;;  %s2658_s19 = smov 0  }
   0x2   :  { %s2660_s20 = smov 0   ;;  %s2662_s21 = smov 0  }
   0x3 LB: > { %s2677_s22 = sadd.s32 4294967295, %s2609_s21   ;;  %s2252_s23 = sadd.s32 4294967294, %s2609_s21   ;;  %s2609_s21 = sphi %s2662_s21, %s3628_s21   ;;  %s2605_s20 = sphi %s2660_s20, %s3627_s20   ;;  %s2601_s19 = sphi %s2658_s19, %s3626_s19   ;;  %s2597_s18 = sphi %s2656_s18, %s3625_s18  }
   0x4   : > { %s2681_s24 = sadd.s32 1, %s2609_s21   ;;  %s135_s25 = sadd.s32 1, %s2605_s20 }
   0x5   : > { %s132_s26 = ssub.s32 %s2609_s21, %s2681_s24  ;;  %p145_p0 = scmp.ne.s32.totalorder %s2605_s20, %s2601_s19 }
   0x6   : > { %p133_p1 = scmp.eq.s32.totalorder %s132_s26, 0  ;;  %p146_p2 = scmp.eq.s32.totalorder %s2677_s22, 1 }
   0x7   : > { %p151_p3 = scmp.ne.s32.totalorder %s2601_s19, %s2597_s18  ;;  %p152_p4 = scmp.eq.s32.totalorder %s2252_s23, 1 }
   0x8   : > { %s2692_s27 = scalar_select %p133_p1, %s2605_s20, %s135_s25  }
   0x9   : > { %p2694_p5 = por %p146_p2, %p145_p0  ;;  %p2698_p6 = por %p152_p4, %p151_p3 }
   0xa   : > { %p2255_p7 = scmp.ge.s32.totalorder %s2609_s21, 1  ;;  %p192_p8 = scmp.lt.s32.totalorder %s2609_s21, 3 }
   0xc   : > { %p193_p9 = pnand %p2255_p7, %p192_p8 }
   0xd   : > { %s2257_s30 = sshll.u32 (!%p193_p9), %s2677_s22, 3  ;;  %s2612_s10 = smov (!%p193_p9), 4  }
   0xe   : > { %196 = sbr.rel (%p193_p9) target bundleno = 914 (0x392), region = 40  ;;  %p222_p10 = scmp.lt.s32.totalorder (!%p193_p9), %s2257_s30, 15 }
   0xf   : > { %s2613_s11 = smov (!%p193_p9), 8   ;;  %s2614_s12 = smov (!%p193_p9), 12  }
  0x10   : > { %s2615_s13 = smov (!%p193_p9), 16   ;;  %s2616_s14 = smov (!%p193_p9), 20  }
  0x11   : > { %s2617_s15 = smov (!%p193_p9), 24   ;;  %s2618_s16 = smov (!%p193_p9), 28  }
  0x12   : > { %s2619_s17 = smov (!%p193_p9), 32   ;;  %s2622_s26 = smov (!%p193_p9), 40  }
  0x13   : > { %vm741_vm0 = vcmask 31744   ;;  %vm743_vm1 = vcmask 25600   ;;  %v2611_v0 = vmov 0.0   ;;  %s3630_s30 = smov (!%p222_p10, %s2257_s30), 15  ;;  %vm828_vm2 = vcmask 1041409  }
  0x14   : > { %742 = vst.msk [vmem:[#allocation2] sm:$0xff] %vm741_vm0, %v2611_v0  ;;  %745 = vst.msk [vmem:[#allocation2 + $0x10] sm:$0xff] %vm741_vm0, %v2611_v0  ;;  %s2412_s6 = sshll.u32 %s3630_s30, 5  ;;  %vm831_vm3 = vcmask 1042434   ;;  %vm834_vm4 = vcmask 1043459   ;;  %vm837_vm5 = vcmask 1044484  }
  0x15   : > { %744 = vst.msk [vmem:[#allocation2 + $0x8] sm:$0x3] %vm743_vm1, %v2611_v0  ;;  %746 = vst.msk [vmem:[#allocation2 + $0x18] sm:$0x3] %vm743_vm1, %v2611_v0  ;;  %s2748_s9 = scalar_lea.vmem %s3617_s0, %s2412_s6  ;;  %vm840_vm6 = vcmask 1045509   ;;  %vm843_vm7 = vcmask 1046534  }
  0x16   : > { %747 = vst.msk [vmem:[#allocation2 + $0x20] sm:$0xff] %vm741_vm0, %v2611_v0  ;;  %749 = vst.msk [vmem:[#allocation2 + $0x30] sm:$0xff] %vm741_vm0, %v2611_v0  ;;  %v228_v3 = vld [vmem:[%s2748_s9] sm:$0x1]  ;;  %v229_v4 = vld [vmem:[%s2748_s9 + $0x2] sm:$0x1] }
  0x17   : > { %748 = vst.msk [vmem:[#allocation2 + $0x28] sm:$0x3] %vm743_vm1, %v2611_v0  ;;  %750 = vst.msk [vmem:[#allocation2 + $0x38] sm:$0x3] %vm743_vm1, %v2611_v0  ;;  %v230_v5 = vld [vmem:[%s2748_s9 + $0x4] sm:$0x1] }
  0x18   : > { %751 = vst.msk [vmem:[#allocation2 + $0x40] sm:$0xff] %vm741_vm0, %v2611_v0  ;;  %753 = vst.msk [vmem:[#allocation2 + $0x50] sm:$0xff] %vm741_vm0, %v2611_v0  ;;  %v231_v6 = vld [vmem:[%s2748_s9 + $0x6] sm:$0x1]  ;;  %v232_v7 = vld [vmem:[%s2748_s9 + $0x8] sm:$0x1] }
  0x19   : > { %752 = vst.msk [vmem:[#allocation2 + $0x48] sm:$0x3] %vm743_vm1, %v2611_v0  ;;  %754 = vst.msk [vmem:[#allocation2 + $0x58] sm:$0x3] %vm743_vm1, %v2611_v0  ;;  %v233_v8 = vld [vmem:[%s2748_s9 + $0xa] sm:$0x1] }
  0x1a   : > { %755 = vst.msk [vmem:[#allocation2 + $0x60] sm:$0xff] %vm741_vm0, %v2611_v0  ;;  %757 = vst.msk [vmem:[#allocation2 + $0x70] sm:$0xff] %vm741_vm0, %v2611_v0  ;;  %v234_v9 = vld [vmem:[%s2748_s9 + $0xc] sm:$0x1]  ;;  %v235_v10 = vld [vmem:[%s2748_s9 + $0xe] sm:$0x1] }
  0x1b   : > { %756 = vst.msk [vmem:[#allocation2 + $0x68] sm:$0x3] %vm743_vm1, %v2611_v0  ;;  %758 = vst.msk [vmem:[#allocation2 + $0x78] sm:$0x3] %vm743_vm1, %v2611_v0  ;;  %v292_v11 = vld [vmem:[%s2748_s9 + $0x1] sm:$0x1] }
  0x1c   : > { %759 = vst.msk [vmem:[#allocation2 + $0x80] sm:$0xff] %vm741_vm0, %v2611_v0  ;;  %761 = vst.msk [vmem:[#allocation2 + $0x90] sm:$0xff] %vm741_vm0, %v2611_v0  ;;  %v979_v1 = vld [vmem:[#allocation2 + $0x1] sm:$0xff]  ;;  %v356_v15 = vadd.f32 %v292_v11, %v228_v3  ;;  %v296_v16 = vld [vmem:[%s2748_s9 + $0x9] sm:$0x1]  ;;  %vm846_vm8 = vcmask 1047559  }
  0x1d   : > { %760 = vst.msk [vmem:[#allocation2 + $0x88] sm:$0x3] %vm743_vm1, %v2611_v0  ;;  %762 = vst.msk [vmem:[#allocation2 + $0x98] sm:$0x3] %vm743_vm1, %v2611_v0  ;;  %v1028_v2 = vld [vmem:[#allocation2 + $0x2] sm:$0xff]  ;;  %995 = vrot.lane.b32.xlu0 %v979_v1, %s2612_s10  ;;  %v360_v23 = vadd.f32 %v296_v16, %v232_v7  ;;  %vm1417_vm9 = vcmask 1043456  }
  0x1e   : > { %1044 = vrot.lane.b32.xlu1 %v1028_v2, %s2613_s11  ;;  %v293_v12 = vld [vmem:[%s2748_s9 + $0x3] sm:$0x1]  ;;  %v294_v13 = vld [vmem:[%s2748_s9 + $0x5] sm:$0x1]  ;;  %v295_v14 = vld [vmem:[%s2748_s9 + $0x7] sm:$0x1] }
  0x1f   : > { %v297_v17 = vld [vmem:[%s2748_s9 + $0xb] sm:$0x1]  ;;  %v298_v18 = vld [vmem:[%s2748_s9 + $0xd] sm:$0x1]  ;;  %v357_v19 = vadd.f32 %v293_v12, %v229_v4  ;;  %v358_v20 = vadd.f32 %v294_v13, %v230_v5  ;;  %v359_v21 = vadd.f32 %v295_v14, %v231_v6  ;;  %v299_v22 = vld [vmem:[%s2748_s9 + $0xf] sm:$0x1] }
  0x20   : > { %v361_v24 = vadd.f32 %v297_v17, %v233_v8  ;;  %v362_v25 = vadd.f32 %v298_v18, %v234_v9  ;;  %v2260_v26 = vld [vmem:[%s2748_s9 + $0x10] sm:$0x1]  ;;  %v2261_v27 = vld [vmem:[%s2748_s9 + $0x12] sm:$0x1]  ;;  %v363_v28 = vadd.f32 %v299_v22, %v235_v10  ;;  %v2262_v29 = vld [vmem:[%s2748_s9 + $0x14] sm:$0x1] }
  0x21   : > { %v2263_v30 = vld [vmem:[%s2748_s9 + $0x16] sm:$0x1]  ;;  %v2264_v31 = vld [vmem:[%s2748_s9 + $0x18] sm:$0x1]  ;;  %v485_v32 = vadd.f32 %v2260_v26, %v356_v15  ;;  %v486_v33 = vadd.f32 %v2261_v27, %v357_v19  ;;  %v2265_v34 = vld [vmem:[%s2748_s9 + $0x1a] sm:$0x1]  ;;  %v487_v37 = vadd.f32 %v2262_v29, %v358_v20 }
  0x22   : > { %v2266_v35 = vld [vmem:[%s2748_s9 + $0x1c] sm:$0x1]  ;;  %v2267_v36 = vld [vmem:[%s2748_s9 + $0x1e] sm:$0x1]  ;;  %v488_v38 = vadd.f32 %v2263_v30, %v359_v21  ;;  %v489_v39 = vadd.f32 %v2264_v31, %v360_v23  ;;  %v490_v40 = vadd.f32 %v2265_v34, %v361_v24  ;;  %v2324_v43 = vld [vmem:[%s2748_s9 + $0x11] sm:$0x1] }
  0x23   : > { %v491_v41 = vadd.f32 %v2266_v35, %v362_v25  ;;  %v492_v42 = vadd.f32 %v2267_v36, %v363_v28  ;;  %v2325_v44 = vld [vmem:[%s2748_s9 + $0x13] sm:$0x1]  ;;  %v2326_v45 = vld [vmem:[%s2748_s9 + $0x15] sm:$0x1]  ;;  %v2327_v46 = vld [vmem:[%s2748_s9 + $0x17] sm:$0x1]  ;;  %v613_v49 = vadd.f32 %v2324_v43, %v485_v32 }
  0x24   : > { %v2328_v47 = vld [vmem:[%s2748_s9 + $0x19] sm:$0x1]  ;;  %v2329_v48 = vld [vmem:[%s2748_s9 + $0x1b] sm:$0x1]  ;;  %v614_v50 = vadd.f32 %v2325_v44, %v486_v33  ;;  %v615_v51 = vadd.f32 %v2326_v45, %v487_v37  ;;  %v2330_v52 = vld [vmem:[%s2748_s9 + $0x1d] sm:$0x1]  ;;  %v616_v54 = vadd.f32 %v2327_v46, %v488_v38 }
  0x25   : > { %v2331_v53 = vld [vmem:[%s2748_s9 + $0x1f] sm:$0x1]  ;;  %v617_v55 = vadd.f32 %v2328_v47, %v489_v39  ;;  %v618_v56 = vadd.f32 %v2329_v48, %v490_v40  ;;  %v619_v57 = vadd.f32 %v2330_v52, %v491_v41  ;;  %v677_v59 = vmul.f32 0.25, %v613_v49  ;;  %v236_v2 = vld [vmem:[%s2748_s9 + $0x20] sm:$0x1]  ;;  %s2623_s30 = smov 64  }
  0x26   : > { %v620_v58 = vadd.f32 %v2331_v53, %v492_v42  ;;  %v678_v60 = vmul.f32 0.25, %v614_v50  ;;  %v679_v61 = vmul.f32 0.25, %v615_v51  ;;  %v680_v62 = vmul.f32 0.25, %v616_v54  ;;  %v237_v3 = vld [vmem:[%s2748_s9 + $0x22] sm:$0x1] }
  0x27   : > { %v681_v63 = vmul.f32 0.25, %v617_v55  ;;  %v682_v1 = vmul.f32 0.25, %v618_v56  ;;  %v238_v4 = vld [vmem:[%s2748_s9 + $0x24] sm:$0x1]  ;;  %v683_v5 = vmul.f32 0.25, %v619_v57  ;;  %vm1019_vm10 = vcmask 64544  }
  0x28   : > { %v684_v6 = vmul.f32 0.25, %v620_v58  ;;  %v827_v7 = vrot.slane %v678_v60, 7  ;;  %v239_v8 = vld [vmem:[%s2748_s9 + $0x26] sm:$0x1]  ;;  %v240_v9 = vld [vmem:[%s2748_s9 + $0x28] sm:$0x1] }
  0x29   : > { %v830_v10 = vrot.slane %v679_v61, 6  ;;  %v833_v11 = vrot.slane %v680_v62, 5  ;;  %v836_v12 = vrot.slane %v681_v63, 4  ;;  %v839_v13 = vrot.slane %v682_v1, 3  ;;  %v241_v14 = vld [vmem:[%s2748_s9 + $0x2a] sm:$0x1] }
  0x2a   : > { %v829_v15 = vsel %vm828_vm2, %v827_v7, %v677_v59  ;;  %v842_v16 = vrot.slane %v683_v5, 2  ;;  %v845_v17 = vrot.slane %v684_v6, 1  ;;  %v242_v18 = vld [vmem:[%s2748_s9 + $0x2c] sm:$0x1]  ;;  %v243_v19 = vld [vmem:[%s2748_s9 + $0x2e] sm:$0x1] }
  0x2b   : > { %v832_v20 = vsel %vm831_vm3, %v830_v10, %v829_v15  ;;  %v300_v21 = vld [vmem:[%s2748_s9 + $0x21] sm:$0x1]  ;;  %v301_v22 = vld [vmem:[%s2748_s9 + $0x23] sm:$0x1]  ;;  %v302_v23 = vld [vmem:[%s2748_s9 + $0x25] sm:$0x1] }
  0x2c   : > { %v835_v24 = vsel %vm834_vm4, %v833_v11, %v832_v20  ;;  %v303_v25 = vld [vmem:[%s2748_s9 + $0x27] sm:$0x1]  ;;  %v304_v26 = vld [vmem:[%s2748_s9 + $0x29] sm:$0x1]  ;;  %v305_v27 = vld [vmem:[%s2748_s9 + $0x2b] sm:$0x1]  ;;  %v364_v28 = vadd.f32 %v300_v21, %v236_v2  ;;  %v365_v29 = vadd.f32 %v301_v22, %v237_v3  ;;  %v366_v30 = vadd.f32 %v302_v23, %v238_v4 }
  0x2d   : > { %v838_v31 = vsel %vm837_vm5, %v836_v12, %v835_v24  ;;  %v306_v32 = vld [vmem:[%s2748_s9 + $0x2d] sm:$0x1]  ;;  %v307_v33 = vld [vmem:[%s2748_s9 + $0x2f] sm:$0x1]  ;;  %v367_v34 = vadd.f32 %v303_v25, %v239_v8  ;;  %v368_v35 = vadd.f32 %v304_v26, %v240_v9  ;;  %v369_v36 = vadd.f32 %v305_v27, %v241_v14  ;;  %v2268_v37 = vld [vmem:[%s2748_s9 + $0x30] sm:$0x1] }
  0x2e   : > { %v841_v38 = vsel %vm840_vm6, %v839_v13, %v838_v31  ;;  %v370_v39 = vadd.f32 %v306_v32, %v242_v18  ;;  %v371_v40 = vadd.f32 %v307_v33, %v243_v19  ;;  %v2269_v41 = vld [vmem:[%s2748_s9 + $0x32] sm:$0x1]  ;;  %v2270_v42 = vld [vmem:[%s2748_s9 + $0x34] sm:$0x1]  ;;  %v2271_v43 = vld [vmem:[%s2748_s9 + $0x36] sm:$0x1]  ;;  %v493_v44 = vadd.f32 %v2268_v37, %v364_v28 }
  0x2f   : > { %v844_v45 = vsel %vm843_vm7, %v842_v16, %v841_v38  ;;  %v2272_v46 = vld [vmem:[%s2748_s9 + $0x38] sm:$0x1]  ;;  %v2273_v47 = vld [vmem:[%s2748_s9 + $0x3a] sm:$0x1]  ;;  %v2274_v48 = vld [vmem:[%s2748_s9 + $0x3c] sm:$0x1]  ;;  %v494_v49 = vadd.f32 %v2269_v41, %v365_v29  ;;  %v495_v50 = vadd.f32 %v2270_v42, %v366_v30  ;;  %v496_v51 = vadd.f32 %v2271_v43, %v367_v34 }
  0x30   : > { %v847_v52 = vsel %vm846_vm8, %v845_v17, %v844_v45  ;;  %v2275_v53 = vld [vmem:[%s2748_s9 + $0x3e] sm:$0x1]  ;;  %v497_v54 = vadd.f32 %v2272_v46, %v368_v35  ;;  %v498_v55 = vadd.f32 %v2273_v47, %v369_v36  ;;  %v499_v56 = vadd.f32 %v2274_v48, %v370_v39  ;;  %v2332_v57 = vld [vmem:[%s2748_s9 + $0x31] sm:$0x1]  ;;  %v2333_v58 = vld [vmem:[%s2748_s9 + $0x33] sm:$0x1] }
  0x31   : > { %955 = vst.msk [vmem:[#allocation2 + $0x11] sm:$0xff] %vm741_vm0, %v847_v52  ;;  %v500_v59 = vadd.f32 %v2275_v53, %v371_v40  ;;  %v2334_v60 = vld [vmem:[%s2748_s9 + $0x35] sm:$0x1]  ;;  %v2335_v61 = vld [vmem:[%s2748_s9 + $0x37] sm:$0x1]  ;;  %v621_v63 = vadd.f32 %v2332_v57, %v493_v44  ;;  %v622_v1 = vadd.f32 %v2333_v58, %v494_v49  ;;  %v963_v12 = vld [vmem:[#allocation2] sm:$0xff] }
  0x32   : > { %v2336_v62 = vld [vmem:[%s2748_s9 + $0x39] sm:$0x1]  ;;  %v2337_v2 = vld [vmem:[%s2748_s9 + $0x3b] sm:$0x1]  ;;  %v2338_v3 = vld [vmem:[%s2748_s9 + $0x3d] sm:$0x1]  ;;  %v623_v5 = vadd.f32 %v2334_v60, %v495_v50  ;;  %v624_v6 = vadd.f32 %v2335_v61, %v496_v51 }
  0x33   : > { %v2339_v4 = vld [vmem:[%s2748_s9 + $0x3f] sm:$0x1]  ;;  %v625_v7 = vadd.f32 %v2336_v62, %v497_v54  ;;  %v626_v8 = vadd.f32 %v2337_v2, %v498_v55  ;;  %v627_v9 = vadd.f32 %v2338_v3, %v499_v56  ;;  %v685_v11 = vmul.f32 0.25, %v621_v63  ;;  %971 = vst.msk [vmem:[#allocation3] sm:$0xff] %vm741_vm0, %v963_v12  ;;  %v244_v23 = vld [vmem:[%s2748_s9 + $0x40] sm:$0x1] }
  0x34   : > { %v628_v10 = vadd.f32 %v2339_v4, %v500_v59  ;;  %v686_v13 = vmul.f32 0.25, %v622_v1  ;;  %v687_v14 = vmul.f32 0.25, %v623_v5  ;;  %v688_v15 = vmul.f32 0.25, %v624_v6  ;;  %v245_v24 = vld [vmem:[%s2748_s9 + $0x42] sm:$0x1] }
  0x35   : > { %v689_v16 = vmul.f32 0.25, %v625_v7  ;;  %v690_v17 = vmul.f32 0.25, %v626_v8  ;;  %v691_v18 = vmul.f32 0.25, %v627_v9  ;;  %v246_v25 = vld [vmem:[%s2748_s9 + $0x44] sm:$0x1]  ;;  %vm1068_vm11 = vcmask 97344  }
  0x36   : > { %v692_v19 = vmul.f32 0.25, %v628_v10  ;;  %v848_v20 = vrot.slane %v686_v13, 7  ;;  %v850_v21 = vrot.slane %v687_v14, 6  ;;  %v852_v22 = vrot.slane %v688_v15, 5  ;;  %v247_v27 = vld [vmem:[%s2748_s9 + $0x46] sm:$0x1] }
  0x37   : > { %v854_v26 = vrot.slane %v689_v16, 4  ;;  %v248_v28 = vld [vmem:[%s2748_s9 + $0x48] sm:$0x1]  ;;  %v249_v29 = vld [vmem:[%s2748_s9 + $0x4a] sm:$0x1]  ;;  %v856_v33 = vrot.slane %v690_v17, 3 }
  0x38   : > { %v2831_v30 = vld [vmem:[#allocation2 + $0x12] sm:$0xff]  ;;  %v849_v32 = vsel %vm828_vm2, %v848_v20, %v685_v11  ;;  %v858_v34 = vrot.slane %v691_v18, 2  ;;  %v860_v37 = vrot.slane %v692_v19, 1  ;;  %v250_v38 = vld [vmem:[%s2748_s9 + $0x4c] sm:$0x1]  ;;  %vm1117_vm12 = vcmask 130144  }
  0x39   : > { %v980_v31 = vld [vmem:[#allocation2 + $0x11] sm:$0xff]  ;;  %1046 = vrot.lane.b32.xlu1 %v2831_v30, %s2613_s11  ;;  %v851_v36 = vsel %vm831_vm3, %v850_v21, %v849_v32  ;;  %v251_v39 = vld [vmem:[%s2748_s9 + $0x4e] sm:$0x1]  ;;  %v308_v42 = vld [vmem:[%s2748_s9 + $0x41] sm:$0x1]  ;;  %vm1166_vm13 = vcmask 162944  }
  0x3a   : > { %v1077_v35 = vld [vmem:[#allocation2 + $0x10] sm:$0xff]  ;;  %997 = vrot.lane.b32.xlu0 %v980_v31, %s2612_s10  ;;  %v853_v41 = vsel %vm834_vm4, %v852_v22, %v851_v36  ;;  %v309_v43 = vld [vmem:[%s2748_s9 + $0x43] sm:$0x1]  ;;  %v310_v44 = vld [vmem:[%s2748_s9 + $0x45] sm:$0x1]  ;;  %v372_v49 = vadd.f32 %v308_v42, %v244_v23  ;;  %vm1215_vm14 = vcmask 195744  }
  0x3b   : > { %v964_v40 = vld [vmem:[#allocation2 + $0x10] sm:$0xff]  ;;  %v855_v45 = vsel %vm837_vm5, %v854_v26, %v853_v41  ;;  %v311_v46 = vld [vmem:[%s2748_s9 + $0x47] sm:$0x1]  ;;  %v312_v47 = vld [vmem:[%s2748_s9 + $0x49] sm:$0x1]  ;;  %v373_v50 = vadd.f32 %v309_v43, %v245_v24  ;;  %v374_v51 = vadd.f32 %v310_v44, %v246_v25  ;;  %vm1265_vm15 = vcmask 228544  }
  0x3c   : > { %972 = vst.msk [vmem:[#allocation3 + $0x8] sm:$0xff] %vm741_vm0, %v964_v40  ;;  %v313_v48 = vld [vmem:[%s2748_s9 + $0x4b] sm:$0x1]  ;;  %v857_v52 = vsel %vm840_vm6, %v856_v33, %v855_v45  ;;  %v314_v53 = vld [vmem:[%s2748_s9 + $0x4d] sm:$0x1]  ;;  %v375_v55 = vadd.f32 %v311_v46, %v247_v27  ;;  %v376_v56 = vadd.f32 %v312_v47, %v248_v28  ;;  %vm1363_vm1 = vcmask 294144  }
  0x3d   : > { %v315_v54 = vld [vmem:[%s2748_s9 + $0x4f] sm:$0x1]  ;;  %v377_v57 = vadd.f32 %v313_v48, %v249_v29  ;;  %v2276_v58 = vld [vmem:[%s2748_s9 + $0x50] sm:$0x1]  ;;  %v859_v59 = vsel %vm843_vm7, %v858_v34, %v857_v52  ;;  %v378_v60 = vadd.f32 %v314_v53, %v250_v38  ;;  %v2277_v62 = vld [vmem:[%s2748_s9 + $0x52] sm:$0x1] }
  0x3e   : > { %1093 = vrot.lane.b32.xlu0 %v1077_v35, %s2614_s12  ;;  %v379_v61 = vadd.f32 %v315_v54, %v251_v39  ;;  %v2278_v63 = vld [vmem:[%s2748_s9 + $0x54] sm:$0x1]  ;;  %v2279_v1 = vld [vmem:[%s2748_s9 + $0x56] sm:$0x1]  ;;  %v501_v2 = vadd.f32 %v2276_v58, %v372_v49  ;;  %v861_v3 = vsel %vm846_vm8, %v860_v37, %v859_v59  ;;  %v2280_v4 = vld [vmem:[%s2748_s9 + $0x58] sm:$0x1]  ;;  %v502_v7 = vadd.f32 %v2277_v62, %v373_v50 }
  0x3f   : > { %v2281_v5 = vld [vmem:[%s2748_s9 + $0x5a] sm:$0x1]  ;;  %v2282_v6 = vld [vmem:[%s2748_s9 + $0x5c] sm:$0x1]  ;;  %v503_v8 = vadd.f32 %v2278_v63, %v374_v51  ;;  %v504_v9 = vadd.f32 %v2279_v1, %v375_v55  ;;  %956 = vst.msk [vmem:[#allocation2 + $0x21] sm:$0xff] %vm741_vm0, %v861_v3  ;;  %v505_v11 = vadd.f32 %v2280_v4, %v376_v56 }
  0x40   : > { %v2283_v10 = vld [vmem:[%s2748_s9 + $0x5e] sm:$0x1]  ;;  %v506_v12 = vadd.f32 %v2281_v5, %v377_v57  ;;  %v507_v13 = vadd.f32 %v2282_v6, %v378_v60  ;;  %v2340_v14 = vld [vmem:[%s2748_s9 + $0x51] sm:$0x1]  ;;  %v2341_v15 = vld [vmem:[%s2748_s9 + $0x53] sm:$0x1] }
  0x41   : > { %v508_v16 = vadd.f32 %v2283_v10, %v379_v61  ;;  %v2342_v17 = vld [vmem:[%s2748_s9 + $0x55] sm:$0x1]  ;;  %v2343_v18 = vld [vmem:[%s2748_s9 + $0x57] sm:$0x1]  ;;  %v2344_v19 = vld [vmem:[%s2748_s9 + $0x59] sm:$0x1]  ;;  %v629_v20 = vadd.f32 %v2340_v14, %v501_v2  ;;  %v630_v21 = vadd.f32 %v2341_v15, %v502_v7 }
  0x42   : > { %1142 = vrot.lane.b32.xlu0 %v980_v31, %s2615_s13  ;;  %v2345_v22 = vld [vmem:[%s2748_s9 + $0x5b] sm:$0x1]  ;;  %v2346_v23 = vld [vmem:[%s2748_s9 + $0x5d] sm:$0x1]  ;;  %v2347_v24 = vld [vmem:[%s2748_s9 + $0x5f] sm:$0x1]  ;;  %v631_v25 = vadd.f32 %v2342_v17, %v503_v8  ;;  %v632_v26 = vadd.f32 %v2343_v18, %v504_v9  ;;  %v633_v27 = vadd.f32 %v2344_v19, %v505_v11 }
  0x43   : > { %v634_v28 = vadd.f32 %v2345_v22, %v506_v12  ;;  %v635_v29 = vadd.f32 %v2346_v23, %v507_v13  ;;  %v636_v32 = vadd.f32 %v2347_v24, %v508_v16  ;;  %v693_v33 = vmul.f32 0.25, %v629_v20  ;;  %v252_v40 = vld [vmem:[%s2748_s9 + $0x60] sm:$0x1]  ;;  %v253_v41 = vld [vmem:[%s2748_s9 + $0x62] sm:$0x1] }
  0x44   : > { %v694_v34 = vmul.f32 0.25, %v630_v21  ;;  %v695_v35 = vmul.f32 0.25, %v631_v25  ;;  %v696_v36 = vmul.f32 0.25, %v632_v26  ;;  %v697_v37 = vmul.f32 0.25, %v633_v27  ;;  %v254_v46 = vld [vmem:[%s2748_s9 + $0x64] sm:$0x1] }
  0x45   : > { %v698_v31 = vmul.f32 0.25, %v634_v28  ;;  %v699_v38 = vmul.f32 0.25, %v635_v29  ;;  %v700_v39 = vmul.f32 0.25, %v636_v32  ;;  %v255_v47 = vld [vmem:[%s2748_s9 + $0x66] sm:$0x1] }
  0x46   : > { %v862_v42 = vrot.slane %v694_v34, 7  ;;  %v864_v43 = vrot.slane %v695_v35, 6  ;;  %v866_v44 = vrot.slane %v696_v36, 5  ;;  %v868_v45 = vrot.slane %v697_v37, 4  ;;  %v2877_v48 = vld [vmem:[#allocation2 + $0x20] sm:$0xff] }
  0x47   : > { %v2879_v49 = vld [vmem:[#allocation2 + $0x21] sm:$0xff]  ;;  %v870_v50 = vrot.slane %v698_v31, 3  ;;  %v872_v51 = vrot.slane %v699_v38, 2  ;;  %1095 = vrot.lane.b32.xlu1 %v2877_v48, %s2614_s12  ;;  %v874_v54 = vrot.slane %v700_v39, 1  ;;  %v257_v55 = vld [vmem:[%s2748_s9 + $0x6a] sm:$0x1] }
  0x48   : > { %v256_v52 = vld [vmem:[%s2748_s9 + $0x68] sm:$0x1]  ;;  %1144 = vrot.lane.b32.xlu0 %v2879_v49, %s2615_s13  ;;  %v863_v53 = vsel %vm828_vm2, %v862_v42, %v693_v33  ;;  %v258_v56 = vld [vmem:[%s2748_s9 + $0x6c] sm:$0x1]  ;;  %v965_v57 = vld [vmem:[#allocation2 + $0x20] sm:$0xff] }
  0x49   : > { %v865_v58 = vsel %vm831_vm3, %v864_v43, %v863_v53  ;;  %v259_v59 = vld [vmem:[%s2748_s9 + $0x6e] sm:$0x1]  ;;  %v316_v60 = vld [vmem:[%s2748_s9 + $0x61] sm:$0x1]  ;;  %v317_v61 = vld [vmem:[%s2748_s9 + $0x63] sm:$0x1] }
  0x4a   : > { %973 = vst.msk [vmem:[#allocation3 + $0x10] sm:$0xff] %vm741_vm0, %v965_v57  ;;  %v867_v62 = vsel %vm834_vm4, %v866_v44, %v865_v58  ;;  %v318_v63 = vld [vmem:[%s2748_s9 + $0x65] sm:$0x1]  ;;  %v319_v1 = vld [vmem:[%s2748_s9 + $0x67] sm:$0x1]  ;;  %v380_v3 = vadd.f32 %v316_v60, %v252_v40  ;;  %v381_v4 = vadd.f32 %v317_v61, %v253_v41 }
  0x4b   : > { %v320_v2 = vld [vmem:[%s2748_s9 + $0x69] sm:$0x1]  ;;  %v869_v5 = vsel %vm837_vm5, %v868_v45, %v867_v62  ;;  %v321_v6 = vld [vmem:[%s2748_s9 + $0x6b] sm:$0x1]  ;;  %v322_v7 = vld [vmem:[%s2748_s9 + $0x6d] sm:$0x1]  ;;  %v382_v9 = vadd.f32 %v318_v63, %v254_v46  ;;  %v383_v10 = vadd.f32 %v319_v1, %v255_v47  ;;  %999 = vrot.lane.b32.xlu1 %v2879_v49, %s2612_s10 }
  0x4c   : > { %v323_v8 = vld [vmem:[%s2748_s9 + $0x6f] sm:$0x1]  ;;  %v384_v11 = vadd.f32 %v320_v2, %v256_v52  ;;  %v871_v12 = vsel %vm840_vm6, %v870_v50, %v869_v5  ;;  %v385_v13 = vadd.f32 %v321_v6, %v257_v55  ;;  %v386_v14 = vadd.f32 %v322_v7, %v258_v56  ;;  %v2284_v16 = vld [vmem:[%s2748_s9 + $0x70] sm:$0x1]  ;;  %v2285_v17 = vld [vmem:[%s2748_s9 + $0x72] sm:$0x1] }
  0x4d   : > { %v387_v15 = vadd.f32 %v323_v8, %v259_v59  ;;  %v2286_v18 = vld [vmem:[%s2748_s9 + $0x74] sm:$0x1]  ;;  %v873_v19 = vsel %vm843_vm7, %v872_v51, %v871_v12  ;;  %v2287_v20 = vld [vmem:[%s2748_s9 + $0x76] sm:$0x1]  ;;  %v2288_v21 = vld [vmem:[%s2748_s9 + $0x78] sm:$0x1]  ;;  %v509_v23 = vadd.f32 %v2284_v16, %v380_v3  ;;  %v510_v24 = vadd.f32 %v2285_v17, %v381_v4 }
  0x4e   : > { %v2289_v22 = vld [vmem:[%s2748_s9 + $0x7a] sm:$0x1]  ;;  %v511_v25 = vadd.f32 %v2286_v18, %v382_v9  ;;  %v875_v26 = vsel %vm846_vm8, %v874_v54, %v873_v19  ;;  %v2290_v27 = vld [vmem:[%s2748_s9 + $0x7c] sm:$0x1]  ;;  %v2291_v28 = vld [vmem:[%s2748_s9 + $0x7e] sm:$0x1]  ;;  %v512_v29 = vadd.f32 %v2287_v20, %v383_v10  ;;  %v513_v32 = vadd.f32 %v2288_v21, %v384_v11 }
  0x4f   : > { %v514_v33 = vadd.f32 %v2289_v22, %v385_v13  ;;  %v2348_v34 = vld [vmem:[%s2748_s9 + $0x71] sm:$0x1]  ;;  %957 = vst.msk [vmem:[#allocation2 + $0x31] sm:$0xff] %vm741_vm0, %v875_v26  ;;  %v515_v35 = vadd.f32 %v2290_v27, %v386_v14  ;;  %v516_v36 = vadd.f32 %v2291_v28, %v387_v15  ;;  %v2349_v37 = vld [vmem:[%s2748_s9 + $0x73] sm:$0x1]  ;;  %1191 = vrot.lane.b32.xlu1 %v2831_v30, %s2616_s14  ;;  %v2925_v46 = vld [vmem:[#allocation2 + $0x22] sm:$0xff] }
  0x50   : > { %v2350_v31 = vld [vmem:[%s2748_s9 + $0x75] sm:$0x1]  ;;  %v2351_v38 = vld [vmem:[%s2748_s9 + $0x77] sm:$0x1]  ;;  %v637_v39 = vadd.f32 %v2348_v34, %v509_v23  ;;  %v2352_v40 = vld [vmem:[%s2748_s9 + $0x79] sm:$0x1]  ;;  %v638_v43 = vadd.f32 %v2349_v37, %v510_v24 }
  0x51   : > { %v2353_v41 = vld [vmem:[%s2748_s9 + $0x7b] sm:$0x1]  ;;  %v2354_v42 = vld [vmem:[%s2748_s9 + $0x7d] sm:$0x1]  ;;  %v639_v44 = vadd.f32 %v2350_v31, %v511_v25  ;;  %v640_v45 = vadd.f32 %v2351_v38, %v512_v29  ;;  %v2355_v47 = vld [vmem:[%s2748_s9 + $0x7f] sm:$0x1]  ;;  %v641_v50 = vadd.f32 %v2352_v40, %v513_v32 }
  0x52   : > { %v642_v51 = vadd.f32 %v2353_v41, %v514_v33  ;;  %v643_v52 = vadd.f32 %v2354_v42, %v515_v35  ;;  %v701_v53 = vmul.f32 0.25, %v637_v39  ;;  %v644_v54 = vadd.f32 %v2355_v47, %v516_v36  ;;  %v260_v1 = vld [vmem:[%s2748_s9 + $0x80] sm:$0x1]  ;;  %v261_v2 = vld [vmem:[%s2748_s9 + $0x82] sm:$0x1] }
  0x53   : > { %v702_v55 = vmul.f32 0.25, %v638_v43  ;;  %v703_v30 = vmul.f32 0.25, %v639_v44  ;;  %v704_v56 = vmul.f32 0.25, %v640_v45  ;;  %v705_v57 = vmul.f32 0.25, %v641_v50  ;;  %1048 = vrot.lane.b32.xlu1 %v2925_v46, %s2613_s11  ;;  %v262_v4 = vld [vmem:[%s2748_s9 + $0x84] sm:$0x1] }
  0x54   : > { %v706_v58 = vmul.f32 0.25, %v642_v51  ;;  %v707_v59 = vmul.f32 0.25, %v643_v52  ;;  %v708_v60 = vmul.f32 0.25, %v644_v54  ;;  %v263_v5 = vld [vmem:[%s2748_s9 + $0x86] sm:$0x1] }
  0x55   : > { %v876_v61 = vrot.slane %v702_v55, 7  ;;  %v878_v62 = vrot.slane %v703_v30, 6  ;;  %v880_v63 = vrot.slane %v704_v56, 5  ;;  %v882_v3 = vrot.slane %v705_v57, 4  ;;  %v264_v11 = vld [vmem:[%s2748_s9 + $0x88] sm:$0x1] }
  0x56   : > { %v2934_v6 = vld [vmem:[#allocation2 + $0x31] sm:$0xff]  ;;  %v884_v8 = vrot.slane %v706_v58, 3  ;;  %v886_v9 = vrot.slane %v707_v59, 2  ;;  %v888_v10 = vrot.slane %v708_v60, 1  ;;  %v265_v14 = vld [vmem:[%s2748_s9 + $0x8a] sm:$0x1] }
  0x57   : > { %v877_v7 = vsel %vm828_vm2, %v876_v61, %v701_v53  ;;  %1001 = vrot.lane.b32.xlu0 %v2934_v6, %s2612_s10  ;;  %v2940_v12 = vld [vmem:[#allocation2 + $0x30] sm:$0xff]  ;;  %v266_v15 = vld [vmem:[%s2748_s9 + $0x8c] sm:$0x1]  ;;  %v267_v16 = vld [vmem:[%s2748_s9 + $0x8e] sm:$0x1]  ;;  %1241 = vrot.lane.b32.xlu1 %v2877_v48, %s2617_s15 }
  0x58   : > { %v879_v13 = vsel %vm831_vm3, %v878_v62, %v877_v7  ;;  %v324_v18 = vld [vmem:[%s2748_s9 + $0x81] sm:$0x1]  ;;  %v325_v19 = vld [vmem:[%s2748_s9 + $0x83] sm:$0x1]  ;;  %v326_v20 = vld [vmem:[%s2748_s9 + $0x85] sm:$0x1] }
  0x59   : > { %v881_v17 = vsel %vm834_vm4, %v880_v63, %v879_v13  ;;  %v327_v22 = vld [vmem:[%s2748_s9 + $0x87] sm:$0x1]  ;;  %v328_v23 = vld [vmem:[%s2748_s9 + $0x89] sm:$0x1]  ;;  %v329_v24 = vld [vmem:[%s2748_s9 + $0x8b] sm:$0x1]  ;;  %v388_v25 = vadd.f32 %v324_v18, %v260_v1  ;;  %v389_v26 = vadd.f32 %v325_v19, %v261_v2  ;;  %v390_v27 = vadd.f32 %v326_v20, %v262_v4 }
  0x5a   : > { %v883_v21 = vsel %vm837_vm5, %v882_v3, %v881_v17  ;;  %v2956_v28 = vld [vmem:[#allocation2 + $0x32] sm:$0xff]  ;;  %v330_v29 = vld [vmem:[%s2748_s9 + $0x8d] sm:$0x1]  ;;  %v331_v32 = vld [vmem:[%s2748_s9 + $0x8f] sm:$0x1]  ;;  %v391_v33 = vadd.f32 %v327_v22, %v263_v5  ;;  %v392_v34 = vadd.f32 %v328_v23, %v264_v11  ;;  %v393_v35 = vadd.f32 %v329_v24, %v265_v14 }
  0x5b   : > { %v885_v48 = vsel %vm840_vm6, %v884_v8, %v883_v21  ;;  %v2292_v36 = vld [vmem:[%s2748_s9 + $0x90] sm:$0x1]  ;;  %1193 = vrot.lane.b32.xlu0 %v2925_v46, %s2616_s14  ;;  %v394_v31 = vadd.f32 %v330_v29, %v266_v15  ;;  %v395_v38 = vadd.f32 %v331_v32, %v267_v16  ;;  %v2293_v39 = vld [vmem:[%s2748_s9 + $0x92] sm:$0x1]  ;;  %v2294_v40 = vld [vmem:[%s2748_s9 + $0x94] sm:$0x1] }
  0x5c   : > { %v887_v37 = vsel %vm843_vm7, %v886_v9, %v885_v48  ;;  %v2295_v41 = vld [vmem:[%s2748_s9 + $0x96] sm:$0x1]  ;;  %v517_v42 = vadd.f32 %v2292_v36, %v388_v25  ;;  %1097 = vrot.lane.b32.xlu1 %v2940_v12, %s2614_s12  ;;  %v2296_v44 = vld [vmem:[%s2748_s9 + $0x98] sm:$0x1]  ;;  %v2297_v45 = vld [vmem:[%s2748_s9 + $0x9a] sm:$0x1]  ;;  %v518_v50 = vadd.f32 %v2293_v39, %v389_v26  ;;  %v519_v51 = vadd.f32 %v2294_v40, %v390_v27 }
  0x5d   : > { %v889_v43 = vsel %vm846_vm8, %v888_v10, %v887_v37  ;;  %v2298_v47 = vld [vmem:[%s2748_s9 + $0x9c] sm:$0x1]  ;;  %v520_v52 = vadd.f32 %v2295_v41, %v391_v33  ;;  %v2299_v53 = vld [vmem:[%s2748_s9 + $0x9e] sm:$0x1]  ;;  %v521_v54 = vadd.f32 %v2296_v44, %v392_v34  ;;  %v522_v55 = vadd.f32 %v2297_v45, %v393_v35  ;;  %v2356_v56 = vld [vmem:[%s2748_s9 + $0x91] sm:$0x1] }
  0x5e   : > { %958 = vst.msk [vmem:[#allocation2 + $0x41] sm:$0xff] %vm741_vm0, %v889_v43  ;;  %v523_v30 = vadd.f32 %v2298_v47, %v394_v31  ;;  %v2357_v57 = vld [vmem:[%s2748_s9 + $0x93] sm:$0x1]  ;;  %v524_v58 = vadd.f32 %v2299_v53, %v395_v38  ;;  %v2358_v59 = vld [vmem:[%s2748_s9 + $0x95] sm:$0x1]  ;;  %v645_v62 = vadd.f32 %v2356_v56, %v517_v42 }
  0x5f   : > { %v2359_v60 = vld [vmem:[%s2748_s9 + $0x97] sm:$0x1]  ;;  %v2360_v61 = vld [vmem:[%s2748_s9 + $0x99] sm:$0x1]  ;;  %v646_v63 = vadd.f32 %v2357_v57, %v518_v50  ;;  %1050 = vrot.lane.b32.xlu0 %v2956_v28, %s2613_s11  ;;  %v2361_v1 = vld [vmem:[%s2748_s9 + $0x9b] sm:$0x1]  ;;  %v647_v4 = vadd.f32 %v2358_v59, %v519_v51 }
  0x60   : > { %v2362_v2 = vld [vmem:[%s2748_s9 + $0x9d] sm:$0x1]  ;;  %v2363_v3 = vld [vmem:[%s2748_s9 + $0x9f] sm:$0x1]  ;;  %v648_v5 = vadd.f32 %v2359_v60, %v520_v52  ;;  %v649_v7 = vadd.f32 %v2360_v61, %v521_v54  ;;  %1290 = vrot.lane.b32.xlu1 %v2879_v49, %s2618_s16  ;;  %v650_v8 = vadd.f32 %v2361_v1, %v522_v55  ;;  %v709_v11 = vmul.f32 0.25, %v645_v62  ;;  %v966_v13 = vld [vmem:[#allocation2 + $0x30] sm:$0xff] }
  0x61   : > { %v651_v9 = vadd.f32 %v2362_v2, %v523_v30  ;;  %v652_v10 = vadd.f32 %v2363_v3, %v524_v58  ;;  %v710_v14 = vmul.f32 0.25, %v646_v63  ;;  %v711_v15 = vmul.f32 0.25, %v647_v4  ;;  %974 = vst.msk [vmem:[#allocation3 + $0x18] sm:$0xff] %vm741_vm0, %v966_v13  ;;  %v268_v21 = vld [vmem:[%s2748_s9 + $0xa0] sm:$0x1] }
  0x62   : > { %v712_v16 = vmul.f32 0.25, %v648_v5  ;;  %v713_v17 = vmul.f32 0.25, %v649_v7  ;;  %v714_v18 = vmul.f32 0.25, %v650_v8  ;;  %v269_v49 = vld [vmem:[%s2748_s9 + $0xa2] sm:$0x1] }
  0x63   : > { %v715_v19 = vmul.f32 0.25, %v651_v9  ;;  %v716_v20 = vmul.f32 0.25, %v652_v10  ;;  %v270_v22 = vld [vmem:[%s2748_s9 + $0xa4] sm:$0x1]  ;;  %1243 = vrot.lane.b32.xlu0 %v2940_v12, %s2617_s15  ;;  %v890_v23 = vrot.slane %v710_v14, 7  ;;  %v892_v24 = vrot.slane %v711_v15, 6 }
  0x64   : > { %v894_v25 = vrot.slane %v712_v16, 5  ;;  %v896_v26 = vrot.slane %v713_v17, 4  ;;  %v271_v27 = vld [vmem:[%s2748_s9 + $0xa6] sm:$0x1]  ;;  %1146 = vrot.lane.b32.xlu1 %v2934_v6, %s2615_s13  ;;  %v898_v29 = vrot.slane %v714_v18, 3 }
  0x65   : > { %v2997_v48 = vld [vmem:[#allocation2 + $0x40] sm:$0xff]  ;;  %v900_v32 = vrot.slane %v715_v19, 2  ;;  %v902_v33 = vrot.slane %v716_v20, 1  ;;  %v272_v12 = vld [vmem:[%s2748_s9 + $0xa8] sm:$0x1]  ;;  %v891_v34 = vsel %vm828_vm2, %v890_v23, %v709_v11 }
  0x66   : > { %v273_v35 = vld [vmem:[%s2748_s9 + $0xaa] sm:$0x1]  ;;  %v274_v36 = vld [vmem:[%s2748_s9 + $0xac] sm:$0x1]  ;;  %v275_v37 = vld [vmem:[%s2748_s9 + $0xae] sm:$0x1]  ;;  %v893_v31 = vsel %vm831_vm3, %v892_v24, %v891_v34 }
  0x67   : > { %975 = vst.msk [vmem:[#allocation3 + $0x20] sm:$0xff] %vm741_vm0, %v2997_v48  ;;  %v332_v38 = vld [vmem:[%s2748_s9 + $0xa1] sm:$0x1]  ;;  %v333_v39 = vld [vmem:[%s2748_s9 + $0xa3] sm:$0x1]  ;;  %1099 = vrot.lane.b32.xlu0 %v2997_v48, %s2614_s12  ;;  %v895_v42 = vsel %vm834_vm4, %v894_v25, %v893_v31 }
  0x68   : > { %v334_v40 = vld [vmem:[%s2748_s9 + $0xa5] sm:$0x1]  ;;  %v335_v43 = vld [vmem:[%s2748_s9 + $0xa7] sm:$0x1]  ;;  %v336_v44 = vld [vmem:[%s2748_s9 + $0xa9] sm:$0x1]  ;;  %v396_v47 = vadd.f32 %v332_v38, %v268_v21  ;;  %v397_v50 = vadd.f32 %v333_v39, %v269_v49  ;;  %1339 = vrot.lane.b32.xlu1 %v2925_v46, %s2619_s17  ;;  %v897_v52 = vsel %vm837_vm5, %v896_v26, %v895_v42 }
  0x69   : > { %v3012_v41 = vld [vmem:[#allocation2 + $0x41] sm:$0xff]  ;;  %v337_v45 = vld [vmem:[%s2748_s9 + $0xab] sm:$0x1]  ;;  %v398_v51 = vadd.f32 %v334_v40, %v270_v22  ;;  %v338_v53 = vld [vmem:[%s2748_s9 + $0xad] sm:$0x1]  ;;  %v399_v55 = vadd.f32 %v335_v43, %v271_v27  ;;  %v400_v30 = vadd.f32 %v336_v44, %v272_v12  ;;  %v899_v58 = vsel %vm840_vm6, %v898_v29, %v897_v52 }
  0x6a   : > { %v339_v54 = vld [vmem:[%s2748_s9 + $0xaf] sm:$0x1]  ;;  %v401_v56 = vadd.f32 %v337_v45, %v273_v35  ;;  %v2300_v57 = vld [vmem:[%s2748_s9 + $0xb0] sm:$0x1]  ;;  %v402_v59 = vadd.f32 %v338_v53, %v274_v36  ;;  %v2301_v61 = vld [vmem:[%s2748_s9 + $0xb2] sm:$0x1]  ;;  %v901_v1 = vsel %vm843_vm7, %v900_v32, %v899_v58 }
  0x6b   : > { %v403_v60 = vadd.f32 %v339_v54, %v275_v37  ;;  %v2302_v62 = vld [vmem:[%s2748_s9 + $0xb4] sm:$0x1]  ;;  %v2303_v46 = vld [vmem:[%s2748_s9 + $0xb6] sm:$0x1]  ;;  %v525_v63 = vadd.f32 %v2300_v57, %v396_v47  ;;  %v2304_v2 = vld [vmem:[%s2748_s9 + $0xb8] sm:$0x1]  ;;  %v526_v5 = vadd.f32 %v2301_v61, %v397_v50  ;;  %1292 = vrot.lane.b32.xlu0 %v2934_v6, %s2618_s16  ;;  %v903_v9 = vsel %vm846_vm8, %v902_v33, %v901_v1 }
  0x6c   : > { %v2305_v3 = vld [vmem:[%s2748_s9 + $0xba] sm:$0x1]  ;;  %v2306_v4 = vld [vmem:[%s2748_s9 + $0xbc] sm:$0x1]  ;;  %v527_v7 = vadd.f32 %v2302_v62, %v398_v51  ;;  %v528_v8 = vadd.f32 %v2303_v46, %v399_v55  ;;  %v2307_v10 = vld [vmem:[%s2748_s9 + $0xbe] sm:$0x1]  ;;  %v529_v11 = vadd.f32 %v2304_v2, %v400_v30  ;;  %1148 = vrot.lane.b32.xlu1 %v3012_v41, %s2615_s13 }
  0x6d   : > { %v530_v13 = vadd.f32 %v2305_v3, %v401_v56  ;;  %v531_v14 = vadd.f32 %v2306_v4, %v402_v59  ;;  %v2364_v15 = vld [vmem:[%s2748_s9 + $0xb1] sm:$0x1]  ;;  %v2365_v16 = vld [vmem:[%s2748_s9 + $0xb3] sm:$0x1]  ;;  %959 = vst.msk [vmem:[#allocation2 + $0x51] sm:$0xff] %vm741_vm0, %v903_v9  ;;  %v532_v17 = vadd.f32 %v2307_v10, %v403_v60  ;;  %v3052_v40 = vld [vmem:[#allocation2 + $0x42] sm:$0xff] }
  0x6e   : > { %v2366_v18 = vld [vmem:[%s2748_s9 + $0xb5] sm:$0x1]  ;;  %v2367_v19 = vld [vmem:[%s2748_s9 + $0xb7] sm:$0x1]  ;;  %v2368_v6 = vld [vmem:[%s2748_s9 + $0xb9] sm:$0x1]  ;;  %v653_v20 = vadd.f32 %v2364_v15, %v525_v63  ;;  %v654_v21 = vadd.f32 %v2365_v16, %v526_v5 }
  0x6f   : > { %v2369_v49 = vld [vmem:[%s2748_s9 + $0xbb] sm:$0x1]  ;;  %v2370_v22 = vld [vmem:[%s2748_s9 + $0xbd] sm:$0x1]  ;;  %v2371_v23 = vld [vmem:[%s2748_s9 + $0xbf] sm:$0x1]  ;;  %v655_v24 = vadd.f32 %v2366_v18, %v527_v7  ;;  %v656_v25 = vadd.f32 %v2367_v19, %v528_v8  ;;  %v657_v26 = vadd.f32 %v2368_v6, %v529_v11  ;;  %1003 = vrot.lane.b32.xlu0 %v3012_v41, %s2612_s10 }
  0x70   : > { %v658_v27 = vadd.f32 %v2369_v49, %v530_v13  ;;  %v659_v29 = vadd.f32 %v2370_v22, %v531_v14  ;;  %v660_v32 = vadd.f32 %v2371_v23, %v532_v17  ;;  %v717_v33 = vmul.f32 0.25, %v653_v20  ;;  %1341 = vrot.lane.b32.xlu1 %v2956_v28, %s2619_s17  ;;  %v276_v39 = vld [vmem:[%s2748_s9 + $0xc0] sm:$0x1]  ;;  %v277_v45 = vld [vmem:[%s2748_s9 + $0xc2] sm:$0x1] }
  0x71   : > { %v718_v12 = vmul.f32 0.25, %v654_v21  ;;  %v719_v34 = vmul.f32 0.25, %v655_v24  ;;  %v720_v35 = vmul.f32 0.25, %v656_v25  ;;  %v721_v36 = vmul.f32 0.25, %v657_v26  ;;  %v278_v47 = vld [vmem:[%s2748_s9 + $0xc4] sm:$0x1] }
  0x72   : > { %v722_v37 = vmul.f32 0.25, %v658_v27  ;;  %v723_v31 = vmul.f32 0.25, %v659_v29  ;;  %v724_v38 = vmul.f32 0.25, %v660_v32  ;;  %v279_v52 = vld [vmem:[%s2748_s9 + $0xc6] sm:$0x1] }
  0x73   : > { %v904_v42 = vrot.slane %v718_v12, 7  ;;  %v906_v43 = vrot.slane %v719_v34, 6  ;;  %v908_v44 = vrot.slane %v720_v35, 5  ;;  %v910_v50 = vrot.slane %v721_v36, 4  ;;  %v280_v53 = vld [vmem:[%s2748_s9 + $0xc8] sm:$0x1]  ;;  %1195 = vrot.lane.b32.xlu0 %v2956_v28, %s2616_s14 }
  0x74   : > { %v912_v51 = vrot.slane %v722_v37, 3  ;;  %v3060_v54 = vld [vmem:[#allocation2 + $0x51] sm:$0xff]  ;;  %v914_v56 = vrot.slane %v723_v31, 2  ;;  %v916_v57 = vrot.slane %v724_v38, 1  ;;  %v281_v58 = vld [vmem:[%s2748_s9 + $0xca] sm:$0x1]  ;;  %1052 = vrot.lane.b32.xlu1 %v3052_v40, %s2613_s11 }
  0x75   : > { %v3062_v55 = vld [vmem:[#allocation2 + $0x50] sm:$0xff]  ;;  %v905_v30 = vsel %vm828_vm2, %v904_v42, %v717_v33  ;;  %v282_v60 = vld [vmem:[%s2748_s9 + $0xcc] sm:$0x1]  ;;  %v283_v28 = vld [vmem:[%s2748_s9 + $0xce] sm:$0x1] }
  0x76   : > { %v907_v59 = vsel %vm831_vm3, %v906_v43, %v905_v30  ;;  %v340_v61 = vld [vmem:[%s2748_s9 + $0xc1] sm:$0x1]  ;;  %976 = vst.msk [vmem:[#allocation3 + $0x28] sm:$0xff] %vm741_vm0, %v3062_v55  ;;  %v341_v46 = vld [vmem:[%s2748_s9 + $0xc3] sm:$0x1] }
  0x77   : > { %v909_v62 = vsel %vm834_vm4, %v908_v44, %v907_v59  ;;  %v342_v63 = vld [vmem:[%s2748_s9 + $0xc5] sm:$0x1]  ;;  %v343_v1 = vld [vmem:[%s2748_s9 + $0xc7] sm:$0x1]  ;;  %v404_v2 = vadd.f32 %v340_v61, %v276_v39  ;;  %v344_v4 = vld [vmem:[%s2748_s9 + $0xc9] sm:$0x1]  ;;  %v405_v8 = vadd.f32 %v341_v46, %v277_v45  ;;  %1005 = vrot.lane.b32.xlu0 %v3060_v54, %s2612_s10 }
  0x78   : > { %v911_v3 = vsel %vm837_vm5, %v910_v50, %v909_v62  ;;  %v345_v5 = vld [vmem:[%s2748_s9 + $0xcb] sm:$0x1]  ;;  %v346_v7 = vld [vmem:[%s2748_s9 + $0xcd] sm:$0x1]  ;;  %v406_v9 = vadd.f32 %v342_v63, %v278_v47  ;;  %v407_v10 = vadd.f32 %v343_v1, %v279_v52  ;;  %v347_v13 = vld [vmem:[%s2748_s9 + $0xcf] sm:$0x1]  ;;  %v408_v14 = vadd.f32 %v344_v4, %v280_v53  ;;  %1245 = vrot.lane.b32.xlu1 %v2997_v48, %s2617_s15 }
  0x79   : > { %v913_v11 = vsel %vm840_vm6, %v912_v51, %v911_v3  ;;  %v409_v15 = vadd.f32 %v345_v5, %v281_v58  ;;  %v410_v16 = vadd.f32 %v346_v7, %v282_v60  ;;  %v2308_v17 = vld [vmem:[%s2748_s9 + $0xd0] sm:$0x1]  ;;  %v2309_v18 = vld [vmem:[%s2748_s9 + $0xd2] sm:$0x1]  ;;  %v411_v6 = vadd.f32 %v347_v13, %v283_v28  ;;  %v2310_v20 = vld [vmem:[%s2748_s9 + $0xd4] sm:$0x1] }
  0x7a   : > { %v915_v19 = vsel %vm843_vm7, %v914_v56, %v913_v11  ;;  %v2311_v21 = vld [vmem:[%s2748_s9 + $0xd6] sm:$0x1]  ;;  %v2312_v49 = vld [vmem:[%s2748_s9 + $0xd8] sm:$0x1]  ;;  %v533_v22 = vadd.f32 %v2308_v17, %v404_v2  ;;  %v534_v23 = vadd.f32 %v2309_v18, %v405_v8  ;;  %v2313_v25 = vld [vmem:[%s2748_s9 + $0xda] sm:$0x1]  ;;  %v535_v48 = vadd.f32 %v2310_v20, %v406_v9 }
  0x7b   : > { %v917_v24 = vsel %vm846_vm8, %v916_v57, %v915_v19  ;;  %v2314_v26 = vld [vmem:[%s2748_s9 + $0xdc] sm:$0x1]  ;;  %v2315_v27 = vld [vmem:[%s2748_s9 + $0xde] sm:$0x1]  ;;  %v536_v29 = vadd.f32 %v2311_v21, %v407_v10  ;;  %v537_v32 = vadd.f32 %v2312_v49, %v408_v14  ;;  %v538_v33 = vadd.f32 %v2313_v25, %v409_v15  ;;  %v2372_v35 = vld [vmem:[%s2748_s9 + $0xd1] sm:$0x1]  ;;  %1197 = vrot.lane.b32.xlu0 %v3052_v40, %s2616_s14 }
  0x7c   : > { %960 = vst.msk [vmem:[#allocation2 + $0x61] sm:$0xff] %vm741_vm0, %v917_v24  ;;  %v539_v12 = vadd.f32 %v2314_v26, %v410_v16  ;;  %v540_v34 = vadd.f32 %v2315_v27, %v411_v6  ;;  %v2373_v36 = vld [vmem:[%s2748_s9 + $0xd3] sm:$0x1]  ;;  %v2374_v37 = vld [vmem:[%s2748_s9 + $0xd5] sm:$0x1]  ;;  %v661_v42 = vadd.f32 %v2372_v35, %v533_v22  ;;  %1101 = vrot.lane.b32.xlu1 %v3062_v55, %s2614_s12 }
  0x7d   : > { %v2375_v31 = vld [vmem:[%s2748_s9 + $0xd7] sm:$0x1]  ;;  %v2376_v38 = vld [vmem:[%s2748_s9 + $0xd9] sm:$0x1]  ;;  %v2377_v39 = vld [vmem:[%s2748_s9 + $0xdb] sm:$0x1]  ;;  %v662_v43 = vadd.f32 %v2373_v36, %v534_v23  ;;  %v663_v44 = vadd.f32 %v2374_v37, %v535_v48 }
  0x7e   : > { %v3109_v45 = vld [vmem:[#allocation2 + $0x52] sm:$0xff]  ;;  %v2378_v47 = vld [vmem:[%s2748_s9 + $0xdd] sm:$0x1]  ;;  %v2379_v50 = vld [vmem:[%s2748_s9 + $0xdf] sm:$0x1]  ;;  %v664_v51 = vadd.f32 %v2375_v31, %v536_v29  ;;  %v665_v52 = vadd.f32 %v2376_v38, %v537_v32  ;;  %v666_v53 = vadd.f32 %v2377_v39, %v538_v33  ;;  %v725_v57 = vmul.f32 0.25, %v661_v42 }
  0x7f   : > { %v667_v30 = vadd.f32 %v2378_v47, %v539_v12  ;;  %v668_v56 = vadd.f32 %v2379_v50, %v540_v34  ;;  %v726_v58 = vmul.f32 0.25, %v662_v43  ;;  %v727_v59 = vmul.f32 0.25, %v663_v44  ;;  %v284_v62 = vld [vmem:[%s2748_s9 + $0xe0] sm:$0x1]  ;;  %1054 = vrot.lane.b32.xlu0 %v3109_v45, %s2613_s11  ;;  %v285_v2 = vld [vmem:[%s2748_s9 + $0xe2] sm:$0x1] }
  0x80   : > { %v728_v60 = vmul.f32 0.25, %v664_v51  ;;  %v729_v28 = vmul.f32 0.25, %v665_v52  ;;  %v730_v61 = vmul.f32 0.25, %v666_v53  ;;  %v286_v3 = vld [vmem:[%s2748_s9 + $0xe4] sm:$0x1]  ;;  %1294 = vrot.lane.b32.xlu1 %v3012_v41, %s2618_s16 }
  0x81   : > { %v731_v46 = vmul.f32 0.25, %v667_v30  ;;  %v732_v63 = vmul.f32 0.25, %v668_v56  ;;  %v918_v1 = vrot.slane %v726_v58, 7  ;;  %v287_v4 = vld [vmem:[%s2748_s9 + $0xe6] sm:$0x1]  ;;  %v920_v5 = vrot.slane %v727_v59, 6 }
  0x82   : > { %v922_v7 = vrot.slane %v728_v60, 5  ;;  %v924_v8 = vrot.slane %v729_v28, 4  ;;  %v288_v9 = vld [vmem:[%s2748_s9 + $0xe8] sm:$0x1]  ;;  %v926_v13 = vrot.slane %v730_v61, 3 }
  0x83   : > { %v3122_v10 = vld [vmem:[#allocation2 + $0x60] sm:$0xff]  ;;  %v919_v11 = vsel %vm828_vm2, %v918_v1, %v725_v57  ;;  %v928_v14 = vrot.slane %v731_v46, 2  ;;  %v930_v15 = vrot.slane %v732_v63, 1  ;;  %v289_v16 = vld [vmem:[%s2748_s9 + $0xea] sm:$0x1]  ;;  %1247 = vrot.lane.b32.xlu0 %v3062_v55, %s2617_s15  ;;  %v1383_v46 = vld [vmem:[%s3618_s1 + $0x18] sm:$0xff] }
  0x84   : > { %v921_v41 = vsel %vm831_vm3, %v920_v5, %v919_v11  ;;  %v290_v17 = vld [vmem:[%s2748_s9 + $0xec] sm:$0x1]  ;;  %v291_v18 = vld [vmem:[%s2748_s9 + $0xee] sm:$0x1]  ;;  %v348_v19 = vld [vmem:[%s2748_s9 + $0xe1] sm:$0x1]  ;;  %1150 = vrot.lane.b32.xlu1 %v3060_v54, %s2615_s13 }
  0x85   : > { %977 = vst.msk [vmem:[#allocation3 + $0x30] sm:$0xff] %vm741_vm0, %v3122_v10  ;;  %v923_v6 = vsel %vm834_vm4, %v922_v7, %v921_v41  ;;  %v349_v20 = vld [vmem:[%s2748_s9 + $0xe3] sm:$0x1]  ;;  %v350_v21 = vld [vmem:[%s2748_s9 + $0xe5] sm:$0x1]  ;;  %v412_v22 = vadd.f32 %v348_v19, %v284_v62 }
  0x86   : > { %v351_v49 = vld [vmem:[%s2748_s9 + $0xe7] sm:$0x1]  ;;  %v925_v23 = vsel %vm837_vm5, %v924_v8, %v923_v6  ;;  %v352_v24 = vld [vmem:[%s2748_s9 + $0xe9] sm:$0x1]  ;;  %v353_v25 = vld [vmem:[%s2748_s9 + $0xeb] sm:$0x1]  ;;  %v413_v55 = vadd.f32 %v349_v20, %v285_v2  ;;  %v414_v27 = vadd.f32 %v350_v21, %v286_v3 }
  0x87   : > { %v354_v26 = vld [vmem:[%s2748_s9 + $0xed] sm:$0x1]  ;;  %v415_v48 = vadd.f32 %v351_v49, %v287_v4  ;;  %v927_v29 = vsel %vm840_vm6, %v926_v13, %v925_v23  ;;  %v355_v32 = vld [vmem:[%s2748_s9 + $0xef] sm:$0x1]  ;;  %v416_v33 = vadd.f32 %v352_v24, %v288_v9  ;;  %v417_v12 = vadd.f32 %v353_v25, %v289_v16  ;;  %v2316_v35 = vld [vmem:[%s2748_s9 + $0xf0] sm:$0x1]  ;;  %1103 = vrot.lane.b32.xlu0 %v3122_v10, %s2614_s12 }
  0x88   : > { %v418_v34 = vadd.f32 %v354_v26, %v290_v17  ;;  %v2317_v36 = vld [vmem:[%s2748_s9 + $0xf2] sm:$0x1]  ;;  %v929_v37 = vsel %vm843_vm7, %v928_v14, %v927_v29  ;;  %v419_v31 = vadd.f32 %v355_v32, %v291_v18  ;;  %v2318_v38 = vld [vmem:[%s2748_s9 + $0xf4] sm:$0x1]  ;;  %v2319_v39 = vld [vmem:[%s2748_s9 + $0xf6] sm:$0x1]  ;;  %v541_v43 = vadd.f32 %v2316_v35, %v412_v22  ;;  %1343 = vrot.lane.b32.xlu1 %v3052_v40, %s2619_s17 }
  0x89   : > { %v2320_v42 = vld [vmem:[%s2748_s9 + $0xf8] sm:$0x1]  ;;  %v542_v44 = vadd.f32 %v2317_v36, %v413_v55  ;;  %v3154_v47 = vld [vmem:[#allocation2 + $0x61] sm:$0xff]  ;;  %v931_v50 = vsel %vm846_vm8, %v930_v15, %v929_v37  ;;  %v2321_v51 = vld [vmem:[%s2748_s9 + $0xfa] sm:$0x1]  ;;  %v543_v30 = vadd.f32 %v2318_v38, %v414_v27  ;;  %v544_v56 = vadd.f32 %v2319_v39, %v415_v48 }
  0x8a   : > { %v2322_v52 = vld [vmem:[%s2748_s9 + $0xfc] sm:$0x1]  ;;  %v2323_v53 = vld [vmem:[%s2748_s9 + $0xfe] sm:$0x1]  ;;  %v545_v57 = vadd.f32 %v2320_v42, %v416_v33  ;;  %961 = vst.msk [vmem:[#allocation2 + $0x71] sm:$0xff] %vm741_vm0, %v931_v50  ;;  %v546_v58 = vadd.f32 %v2321_v51, %v417_v12  ;;  %v1382_v20 = vld [vmem:[%s3618_s1 + $0x10] sm:$0xff] }
  0x8b   : > { %v547_v59 = vadd.f32 %v2322_v52, %v418_v34  ;;  %v548_v60 = vadd.f32 %v2323_v53, %v419_v31  ;;  %v2380_v28 = vld [vmem:[%s2748_s9 + $0xf1] sm:$0x1]  ;;  %v2381_v61 = vld [vmem:[%s2748_s9 + $0xf3] sm:$0x1]  ;;  %v2382_v62 = vld [vmem:[%s2748_s9 + $0xf5] sm:$0x1]  ;;  %1296 = vrot.lane.b32.xlu0 %v3060_v54, %s2618_s16 }
  0x8c   : > { %v2383_v63 = vld [vmem:[%s2748_s9 + $0xf7] sm:$0x1]  ;;  %v2384_v1 = vld [vmem:[%s2748_s9 + $0xf9] sm:$0x1]  ;;  %v2385_v2 = vld [vmem:[%s2748_s9 + $0xfb] sm:$0x1]  ;;  %v669_v3 = vadd.f32 %v2380_v28, %v541_v43  ;;  %v670_v4 = vadd.f32 %v2381_v61, %v542_v44  ;;  %v671_v5 = vadd.f32 %v2382_v62, %v543_v30  ;;  %1152 = vrot.lane.b32.xlu1 %v3154_v47, %s2615_s13 }
  0x8d   : > { %v2386_v40 = vld [vmem:[%s2748_s9 + $0xfd] sm:$0x1]  ;;  %v2387_v7 = vld [vmem:[%s2748_s9 + $0xff] sm:$0x1]  ;;  %v672_v8 = vadd.f32 %v2383_v63, %v544_v56  ;;  %v673_v9 = vadd.f32 %v2384_v1, %v545_v57  ;;  %v674_v11 = vadd.f32 %v2385_v2, %v546_v58  ;;  %v1384_v13 = vld [vmem:[%s3618_s1 + $0x20] sm:$0xf] }
  0x8e   : > { %v675_v14 = vadd.f32 %v2386_v40, %v547_v59  ;;  %v676_v15 = vadd.f32 %v2387_v7, %v548_v60  ;;  %v733_v16 = vmul.f32 0.25, %v669_v3  ;;  %v734_v41 = vmul.f32 0.25, %v670_v4  ;;  %2444 = vmatprep.subr.msk.mxu0 %vm1417_vm9, %v1384_v13  ;;  %v1381_v55 = vld [vmem:[%s3618_s1 + $0x8] sm:$0xff]  ;;  %v1380_v12 = vld [vmem:[%s3618_s1] sm:$0xff]  ;;  %v1232_v52 = vld [vmem:[#allocation2 + $0x90] sm:$0xff] }
  0x8f   : > { %v735_v17 = vmul.f32 0.25, %v671_v5  ;;  %v736_v18 = vmul.f32 0.25, %v672_v8  ;;  %v737_v19 = vmul.f32 0.25, %v673_v9  ;;  %v738_v6 = vmul.f32 0.25, %v674_v11  ;;  %2445 = vmatpush3.msk.msra.mxu0 %vm1417_vm9, %v1384_v13  ;;  %v996_v25 = vpop.permute.xlu0 %995  ;;  %1007 = vrot.lane.b32.xlu0 %v3154_v47, %s2612_s10  ;;  %v1180_v37 = vld [vmem:[#allocation2 + $0x62] sm:$0xff]  ;;  %v1281_v30 = vld [vmem:[#allocation2 + $0x91] sm:$0xff] }
  0x90   : > { %v739_v54 = vmul.f32 0.25, %v675_v14  ;;  %v740_v21 = vmul.f32 0.25, %v676_v15  ;;  %v932_v49 = vrot.slane %v734_v41, 7  ;;  %2446 = vmatprep.subr.mxu0 %v1383_v46  ;;  %v1045_v26 = vpop.permute.xlu1 %1044  ;;  %1020 = vst.msk [vmem:[#allocation3] sm:$0xff] %vm1019_vm10, %v996_v25  ;;  %1345 = vrot.lane.b32.xlu1 %v3109_v45, %s2619_s17  ;;  %v1330_v56 = vld [vmem:[#allocation2 + $0x92] sm:$0xff] }
  0x91   : > { %v934_v22 = vrot.slane %v735_v17, 6  ;;  %v936_v23 = vrot.slane %v736_v18, 5  ;;  %v938_v24 = vrot.slane %v737_v19, 4  ;;  %2447 = vmatpush3.msra.mxu0 %v1383_v46  ;;  %v1230_v27 = vld [vmem:[#allocation2 + $0x70] sm:$0xff]  ;;  %v940_v29 = vrot.slane %v738_v6, 3  ;;  %1069 = vst.msk [vmem:[#allocation3] sm:$0xff] %vm1068_vm11, %v1045_v26 }
  0x92   : > { %v933_v48 = vsel %vm828_vm2, %v932_v49, %v733_v16  ;;  %2448 = vmatprep.subr.mxu0 %v1382_v20  ;;  %v942_v33 = vrot.slane %v739_v54, 2  ;;  %978 = vst.msk [vmem:[#allocation3 + $0x38] sm:$0xff] %vm741_vm0, %v1230_v27  ;;  %v944_v35 = vrot.slane %v740_v21, 1  ;;  %v986_v38 = vld [vmem:[#allocation2 + $0x71] sm:$0xff]  ;;  %vm1392_vm2 = vcmask 293888  }
  0x93   : > { %v935_v32 = vsel %vm831_vm3, %v934_v22, %v933_v48  ;;  %2449 = vmatpush3.msra.mxu0 %v1382_v20  ;;  %1199 = vrot.lane.b32.xlu0 %v3109_v45, %s2616_s14  ;;  %v1035_v45 = vld [vmem:[#allocation2 + $0x72] sm:$0xff]  ;;  %vm1550_vm3 = vcmask 64512  }
  0x94   : > { %v937_v34 = vsel %vm834_vm4, %v936_v23, %v935_v32  ;;  %2450 = vmatprep.subr.mxu0 %v1381_v55  ;;  %1056 = vrot.lane.b32.xlu1 %v1180_v37, %s2613_s11  ;;  %vm1552_vm4 = vcmask 58368   ;;  %1556 = vst.msk [vmem:[#allocation4 + $0x20] sm:$0xff] %vm1550_vm3, %v2611_v0  ;;  %1551 = vst.msk [vmem:[#allocation4] sm:$0xff] %vm1550_vm3, %v2611_v0 }
  0x95   : > { %v939_v36 = vsel %vm837_vm5, %v938_v24, %v937_v34  ;;  %2451 = vmatpush3.msra.mxu0 %v1381_v55  ;;  %1557 = vst.msk [vmem:[#allocation4 + $0x28] sm:$0x3] %vm1552_vm4, %v2611_v0  ;;  %1553 = vst.msk [vmem:[#allocation4 + $0x8] sm:$0x3] %vm1552_vm4, %v2611_v0  ;;  %vm1637_vm5 = vcmask 130112  }
  0x96   : > { %v941_v31 = vsel %vm840_vm6, %v940_v29, %v939_v36  ;;  %2452 = vmatprep.subr.mxu0 %v1380_v12  ;;  %1554 = vst.msk [vmem:[#allocation4 + $0x10] sm:$0xff] %vm1550_vm3, %v2611_v0  ;;  %1558 = vst.msk [vmem:[#allocation4 + $0x30] sm:$0xff] %vm1550_vm3, %v2611_v0  ;;  %vm1686_vm6 = vcmask 195712  }
  0x97   : > { %v943_v39 = vsel %vm843_vm7, %v942_v33, %v941_v31  ;;  %2453 = vmatpush3.msra.mxu0 %v1380_v12  ;;  %1009 = vrot.lane.b32.xlu0 %v986_v38, %s2612_s10  ;;  %1555 = vst.msk [vmem:[#allocation4 + $0x18] sm:$0x3] %vm1552_vm4, %v2611_v0  ;;  %1559 = vst.msk [vmem:[#allocation4 + $0x38] sm:$0x3] %vm1552_vm4, %v2611_v0  ;;  %s2620_s10 = smov 48  }
  0x98   : > { %v945_v42 = vsel %vm846_vm8, %v944_v35, %v943_v39  ;;  %1249 = vrot.lane.b32.xlu1 %v3122_v10, %s2617_s15  ;;  %1560 = vst.msk [vmem:[#allocation4 + $0x40] sm:$0xff] %vm1550_vm3, %v2611_v0  ;;  %1562 = vst.msk [vmem:[#allocation4 + $0x50] sm:$0xff] %vm1550_vm3, %v2611_v0 }
  0x99   : > { %962 = vst.msk [vmem:[#allocation2 + $0x81] sm:$0xff] %vm741_vm0, %v945_v42  ;;  %vm1314_vm0 = vcmask 261344  }
  0x9a   : > { %1561 = vst.msk [vmem:[#allocation4 + $0x48] sm:$0x3] %vm1552_vm4, %v2611_v0  ;;  %1563 = vst.msk [vmem:[#allocation4 + $0x58] sm:$0x3] %vm1552_vm4, %v2611_v0 }
  0x9b   : > { %1201 = vrot.lane.b32.xlu0 %v1180_v37, %s2616_s14  ;;  %1564 = vst.msk [vmem:[#allocation4 + $0x60] sm:$0xff] %vm1550_vm3, %v2611_v0  ;;  %1566 = vst.msk [vmem:[#allocation4 + $0x70] sm:$0xff] %vm1550_vm3, %v2611_v0 }
  0x9c   : > { %1105 = vrot.lane.b32.xlu1 %v1230_v27, %s2614_s12  ;;  %1565 = vst.msk [vmem:[#allocation4 + $0x68] sm:$0x3] %vm1552_vm4, %v2611_v0  ;;  %1567 = vst.msk [vmem:[#allocation4 + $0x78] sm:$0x3] %vm1552_vm4, %v2611_v0 }
  0x9d   : > { %1568 = vst.msk [vmem:[#allocation4 + $0x80] sm:$0xff] %vm1550_vm3, %v2611_v0  ;;  %1570 = vst.msk [vmem:[#allocation4 + $0x90] sm:$0xff] %vm1550_vm3, %v2611_v0 }
  0x9e   : > { %1569 = vst.msk [vmem:[#allocation4 + $0x88] sm:$0x3] %vm1552_vm4, %v2611_v0  ;;  %1571 = vst.msk [vmem:[#allocation4 + $0x98] sm:$0x3] %vm1552_vm4, %v2611_v0  ;;  %vm1932_vm4 = vcmask 523712  }
  0x9f   : > { %1058 = vrot.lane.b32.xlu0 %v1035_v45, %s2613_s11 }
  0xa0   : > { %1298 = vrot.lane.b32.xlu1 %v3154_v47, %s2618_s16  ;;  %v1084_v43 = vld [vmem:[#allocation2 + $0x80] sm:$0xff] }
  0xa1   : > { %v1133_v10 = vld [vmem:[#allocation2 + $0x81] sm:$0xff] }
  0xa2   : > { %v1182_v51 = vld [vmem:[#allocation2 + $0x82] sm:$0xff] }
  0xa3   : > { %1251 = vrot.lane.b32.xlu0 %v1230_v27, %s2617_s15 }
  0xa4   : > { %1154 = vrot.lane.b32.xlu1 %v986_v38, %s2615_s13 }
  0xa5   : > { %v1899_v0 = vld [vmem:[#allocation4 + $0x91] sm:$0xff] }
  0xa7   : > { %1107 = vrot.lane.b32.xlu0 %v1084_v43, %s2614_s12  ;;  %s2621_s12 = smov 56  }
  0xa8   : > { %1347 = vrot.lane.b32.xlu1 %v1180_v37, %s2619_s17 }
  0xab   : > { %1300 = vrot.lane.b32.xlu0 %v986_v38, %s2618_s16  ;;  %v1047_v44 = vpop.permute.xlu1 %1046 }
  0xac   : > { %v998_v50 = vpop.permute.xlu0 %997  ;;  %1203 = vrot.lane.b32.xlu1 %v1035_v45, %s2616_s14 }
  0xad   : > { %1021 = vst.msk [vmem:[#allocation3 + $0x8] sm:$0xff] %vm1019_vm10, %v998_v50 }
  0xae   : > { %1070 = vst.msk [vmem:[#allocation3 + $0x8] sm:$0xff] %vm1068_vm11, %v1047_v44 }
  0xaf   : > { %1156 = vrot.lane.b32.xlu0 %v1133_v10, %s2615_s13 }
  0xb0   : > { %v1094_v47 = vpop.permute.xlu0 %1093  ;;  %1205 = vrot.lane.b32.xlu1 %v1182_v51, %s2616_s14  ;;  %s2624_s14 = smov [#allocation6]  }
  0xb1   : > { %1118 = vst.msk [vmem:[#allocation3] sm:$0xff] %vm1117_vm12, %v1094_v47 }
  0xb3   : > { %1349 = vrot.lane.b32.xlu0 %v1035_v45, %s2619_s17 }
  0xb4   : > { %v1143_v53 = vpop.permute.xlu0 %1142  ;;  %1255 = vrot.lane.b32.xlu1 %v1232_v52, %s2617_s15 }
  0xb5   : > { %1167 = vst.msk [vmem:[#allocation3] sm:$0xff] %vm1166_vm13, %v1143_v53 }
  0xb7   : > { %1253 = vrot.lane.b32.xlu0 %v1084_v43, %s2617_s15 }
  0xb8   : > { %1304 = vrot.lane.b32.xlu1 %v1281_v30, %s2618_s16 }
  0xb9   : > { %v1096_v57 = vpop.permute.xlu1 %1095 }
  0xba   : > { %v1145_v58 = vpop.permute.xlu0 %1144  ;;  %1119 = vst.msk [vmem:[#allocation3 + $0x8] sm:$0xff] %vm1117_vm12, %v1096_v57 }
  0xbb   : > { %1302 = vrot.lane.b32.xlu0 %v1133_v10, %s2618_s16  ;;  %1168 = vst.msk [vmem:[#allocation3 + $0x8] sm:$0xff] %vm1166_vm13, %v1145_v58  ;;  %v1850_v58 = vld [vmem:[#allocation4 + $0x90] sm:$0xff]  ;;  %s2553_s16 = sshll.u32 %s2624_s14, 4  ;;  %s2554_s16 = int_to_ptr.vmem [resolvable:$false] %s2553_s16 }
  0xbc   : > { %1353 = vrot.lane.b32.xlu1 %v1330_v56, %s2619_s17  ;;  %s2555_s6 = scalar_lea.vmem %s2554_s16, 2048 }
  0xbd   : > { %v1000_v59 = vpop.permute.xlu1 %999 }
  0xbe   : > { %1022 = vst.msk [vmem:[#allocation3 + $0x10] sm:$0xff] %vm1019_vm10, %v1000_v59  ;;  %v1597_v59 = vld [vmem:[#allocation4 + $0x1] sm:$0xff] }
  0xbf   : > { %1351 = vrot.lane.b32.xlu0 %v1182_v51, %s2619_s17 }
  0xc0   : > { %1873 = vrot.lane.b32.xlu1 %v1850_v58, %s2620_s10 }
  0xc1   : > { %v1192_v60 = vpop.permute.xlu1 %1191 }
  0xc2   : > { %1216 = vst.msk [vmem:[#allocation3] sm:$0xff] %vm1215_vm14, %v1192_v60  ;;  %v1646_v60 = vld [vmem:[#allocation4 + $0x2] sm:$0xff] }
  0xc3   : > { %1613 = vrot.lane.b32.xlu0 %v1597_v59, %s2613_s11 }
  0xc4   : > { %1922 = vrot.lane.b32.xlu1 %v1899_v0, %s2621_s12 }
  0xc5   : > { %v1049_v28 = vpop.permute.xlu1 %1048 }
  0xc6   : > { %1071 = vst.msk [vmem:[#allocation3 + $0x10] sm:$0xff] %vm1068_vm11, %v1049_v28 }
  0xc7   : > { %1662 = vrot.lane.b32.xlu0 %v1646_v60, %s2615_s13 }
  0xc9   : > { %v1002_v61 = vpop.permute.xlu0 %1001  ;;  %v1242_v62 = vpop.permute.xlu1 %1241 }
  0xca   : > { %1023 = vst.msk [vmem:[#allocation3 + $0x18] sm:$0xff] %vm1019_vm10, %v1002_v61 }
  0xcb   : > { %1266 = vst.msk [vmem:[#allocation3] sm:$0xff] %vm1265_vm15, %v1242_v62  ;;  %v1581_v62 = vld [vmem:[#allocation4] sm:$0xff] }
  0xcc   : > { %1589 = vst.msk [vmem:[#allocation5] sm:$0xff] %vm1550_vm3, %v1581_v62 }
  0xcd   : > { %v1194_v46 = vpop.permute.xlu0 %1193 }
  0xce   : > { %1217 = vst.msk [vmem:[#allocation3 + $0x8] sm:$0xff] %vm1215_vm14, %v1194_v46  ;;  %v1098_v63 = vpop.permute.xlu1 %1097 }
  0xcf   : > { %1120 = vst.msk [vmem:[#allocation3 + $0x10] sm:$0xff] %vm1117_vm12, %v1098_v63  ;;  %v3352_v63 = vld [vmem:[%s3619_s2] ss:$0 sm:$0xff] }
  0xd1   : > { %v1051_v1 = vpop.permute.xlu0 %1050 }
  0xd2   : > { %1072 = vst.msk [vmem:[#allocation3 + $0x18] sm:$0xff] %vm1068_vm11, %v1051_v1  ;;  %v1291_v2 = vpop.permute.xlu1 %1290 }
  0xd3   : > { %1315 = vst.msk [vmem:[#allocation3] sm:$0xff] %vm1314_vm0, %v1291_v2 }
  0xd5   : > { %v1244_v3 = vpop.permute.xlu0 %1243 }
  0xd6   : > { %1267 = vst.msk [vmem:[#allocation3 + $0x8] sm:$0xff] %vm1265_vm15, %v1244_v3  ;;  %v1147_v4 = vpop.permute.xlu1 %1146 }
  0xd7   : > { %1169 = vst.msk [vmem:[#allocation3 + $0x10] sm:$0xff] %vm1166_vm13, %v1147_v4 }
  0xd9   : > { %v1100_v5 = vpop.permute.xlu0 %1099 }
  0xda   : > { %1121 = vst.msk [vmem:[#allocation3 + $0x18] sm:$0xff] %vm1117_vm12, %v1100_v5  ;;  %v1340_v40 = vpop.permute.xlu1 %1339 }
  0xdb   : > { %1364 = vst.msk [vmem:[#allocation3] sm:$0xff] %vm1363_vm1, %v1340_v40 }
  0xdd   : > { %v1293_v7 = vpop.permute.xlu0 %1292 }
  0xde   : > { %1316 = vst.msk [vmem:[#allocation3 + $0x8] sm:$0xff] %vm1314_vm0, %v1293_v7  ;;  %v1149_v8 = vpop.permute.xlu1 %1148 }
  0xdf   : > { %1170 = vst.msk [vmem:[#allocation3 + $0x18] sm:$0xff] %vm1166_vm13, %v1149_v8 }
  0xe1   : > { %v1004_v9 = vpop.permute.xlu0 %1003 }
  0xe2   : > { %1024 = vst.msk [vmem:[#allocation3 + $0x20] sm:$0xff] %vm1019_vm10, %v1004_v9  ;;  %v1342_v11 = vpop.permute.xlu1 %1341  ;;  %v1372_v13 = vld [vmem:[#allocation3] sm:$0xff] }
  0xe3   : > { %1365 = vst.msk [vmem:[#allocation3 + $0x8] sm:$0xff] %vm1363_vm1, %v1342_v11  ;;  %2454 = vmatprep.mubr.msk.f32.mxu0 %vm1392_vm2, %v1372_v13 }
  0xe5   : > { %v1196_v14 = vpop.permute.xlu0 %1195 }
  0xe6   : > { %1218 = vst.msk [vmem:[#allocation3 + $0x10] sm:$0xff] %vm1215_vm14, %v1196_v14  ;;  %v1053_v15 = vpop.permute.xlu1 %1052 }
  0xe7   : > { %1073 = vst.msk [vmem:[#allocation3 + $0x20] sm:$0xff] %vm1068_vm11, %v1053_v15 }
  0xe9   : > { %v1006_v16 = vpop.permute.xlu0 %1005 }
  0xea   : > { %1025 = vst.msk [vmem:[#allocation3 + $0x28] sm:$0xff] %vm1019_vm10, %v1006_v16  ;;  %v1246_v41 = vpop.permute.xlu1 %1245  ;;  %v1373_v17 = vld [vmem:[#allocation3 + $0x8] sm:$0xff] }
  0xeb   : > { %1268 = vst.msk [vmem:[#allocation3 + $0x10] sm:$0xff] %vm1265_vm15, %v1246_v41  ;;  %2455 = vmatmul.mubr.msk.f32.vlgmr.msra.gmra.mxu0 %vm1392_vm2, %v1373_v17 }
  0xed   : > { %v1198_v18 = vpop.permute.xlu0 %1197 }
  0xee   : > { %1219 = vst.msk [vmem:[#allocation3 + $0x18] sm:$0xff] %vm1215_vm14, %v1198_v18  ;;  %v1102_v19 = vpop.permute.xlu1 %1101 }
  0xef   : > { %1122 = vst.msk [vmem:[#allocation3 + $0x20] sm:$0xff] %vm1117_vm12, %v1102_v19 }
  0xf1   : > { %v1055_v6 = vpop.permute.xlu0 %1054 }
  0xf2   : > { %1074 = vst.msk [vmem:[#allocation3 + $0x28] sm:$0xff] %vm1068_vm11, %v1055_v6  ;;  %v1295_v20 = vpop.permute.xlu1 %1294 }
  0xf3   : > { %1317 = vst.msk [vmem:[#allocation3 + $0x10] sm:$0xff] %vm1314_vm0, %v1295_v20 }
  0xf5   : > { %v1248_v54 = vpop.permute.xlu0 %1247 }
  0xf6   : > { %1269 = vst.msk [vmem:[#allocation3 + $0x18] sm:$0xff] %vm1265_vm15, %v1248_v54  ;;  %v1151_v21 = vpop.permute.xlu1 %1150 }
  0xf7   : > { %1171 = vst.msk [vmem:[#allocation3 + $0x20] sm:$0xff] %vm1166_vm13, %v1151_v21 }
  0xf9   : > { %v1104_v49 = vpop.permute.xlu0 %1103 }
  0xfa   : > { %1123 = vst.msk [vmem:[#allocation3 + $0x28] sm:$0xff] %vm1117_vm12, %v1104_v49  ;;  %v1344_v22 = vpop.permute.xlu1 %1343 }
  0xfb   : > { %1366 = vst.msk [vmem:[#allocation3 + $0x10] sm:$0xff] %vm1363_vm1, %v1344_v22 }
  0xfd   : > { %v1297_v23 = vpop.permute.xlu0 %1296 }
  0xfe   : > { %1318 = vst.msk [vmem:[#allocation3 + $0x18] sm:$0xff] %vm1314_vm0, %v1297_v23  ;;  %v1153_v24 = vpop.permute.xlu1 %1152 }
  0xff   : > { %1172 = vst.msk [vmem:[#allocation3 + $0x28] sm:$0xff] %vm1166_vm13, %v1153_v24 }
 0x101   : > { %v1008_v25 = vpop.permute.xlu0 %1007 }
 0x102   : > { %1026 = vst.msk [vmem:[#allocation3 + $0x30] sm:$0xff] %vm1019_vm10, %v1008_v25  ;;  %v1346_v26 = vpop.permute.xlu1 %1345  ;;  %v1374_v55 = vld [vmem:[#allocation3 + $0x10] sm:$0xff] }
 0x103   : > { %1367 = vst.msk [vmem:[#allocation3 + $0x18] sm:$0xff] %vm1363_vm1, %v1346_v26  ;;  %2457 = vmatprep.mubr.msk.f32.mxu0 %vm1392_vm2, %v1374_v55  ;;  %v2006_v26 = vld [vmem:[%s3620_s3 + $0x40] sm:$0xff] }
 0x104   : > { %2466 = vmatprep.subr.mxu1 %v2006_v26 }
 0x105   : > { %v1200_v27 = vpop.permute.xlu0 %1199  ;;  %2467 = vmatpush3.msra.mxu1 %v2006_v26 }
 0x106   : > { %1220 = vst.msk [vmem:[#allocation3 + $0x20] sm:$0xff] %vm1215_vm14, %v1200_v27  ;;  %v1057_v48 = vpop.permute.xlu1 %1056  ;;  %v2005_v27 = vld [vmem:[%s3620_s3 + $0x38] sm:$0xff] }
 0x107   : > { %1075 = vst.msk [vmem:[#allocation3 + $0x30] sm:$0xff] %vm1068_vm11, %v1057_v48  ;;  %v2004_v48 = vld [vmem:[%s3620_s3 + $0x30] sm:$0xff]  ;;  %2468 = vmatprep.subr.mxu1 %v2005_v27 }
 0x108   : > { %2469 = vmatpush3.msra.mxu1 %v2005_v27 }
 0x109   : > { %v1010_v29 = vpop.permute.xlu0 %1009  ;;  %2470 = vmatprep.subr.mxu1 %v2004_v48 }
 0x10a   : > { %1027 = vst.msk [vmem:[#allocation3 + $0x38] sm:$0xff] %vm1019_vm10, %v1010_v29  ;;  %v1375_v32 = vld [vmem:[#allocation3 + $0x18] sm:$0xff]  ;;  %v1250_v33 = vpop.permute.xlu1 %1249  ;;  %2471 = vmatpush3.msra.mxu1 %v2004_v48 }
 0x10b   : > { %2458 = vmatmul.mubr.msk.f32.gmra.mxu0 %vm1392_vm2, %v1375_v32  ;;  %1270 = vst.msk [vmem:[#allocation3 + $0x20] sm:$0xff] %vm1265_vm15, %v1250_v33  ;;  %v2003_v32 = vld [vmem:[%s3620_s3 + $0x28] sm:$0xff]  ;;  %v2002_v33 = vld [vmem:[%s3620_s3 + $0x20] sm:$0xff] }
 0x10c   : > { %2472 = vmatprep.subr.mxu1 %v2003_v32 }
 0x10d   : > { %v1202_v12 = vpop.permute.xlu0 %1201  ;;  %2473 = vmatpush3.msra.mxu1 %v2003_v32 }
 0x10e   : > { %1221 = vst.msk [vmem:[#allocation3 + $0x28] sm:$0xff] %vm1215_vm14, %v1202_v12  ;;  %v1106_v34 = vpop.permute.xlu1 %1105  ;;  %2474 = vmatprep.subr.mxu1 %v2002_v33 }
 0x10f   : > { %1124 = vst.msk [vmem:[#allocation3 + $0x30] sm:$0xff] %vm1117_vm12, %v1106_v34  ;;  %v2001_v34 = vld [vmem:[%s3620_s3 + $0x18] sm:$0xff]  ;;  %2475 = vmatpush3.msra.mxu1 %v2002_v33 }
 0x110   : > { %2476 = vmatprep.subr.mxu1 %v2001_v34 }
 0x111   : > { %v1059_v35 = vpop.permute.xlu0 %1058  ;;  %2477 = vmatpush3.msra.mxu1 %v2001_v34 }
 0x112   : > { %1076 = vst.msk [vmem:[#allocation3 + $0x38] sm:$0xff] %vm1068_vm11, %v1059_v35  ;;  %v1299_v36 = vpop.permute.xlu1 %1298 }
 0x113   : > { %1319 = vst.msk [vmem:[#allocation3 + $0x20] sm:$0xff] %vm1314_vm0, %v1299_v36 }
 0x115   : > { %v1252_v37 = vpop.permute.xlu0 %1251 }
 0x116   : > { %1271 = vst.msk [vmem:[#allocation3 + $0x28] sm:$0xff] %vm1265_vm15, %v1252_v37  ;;  %v1155_v31 = vpop.permute.xlu1 %1154  ;;  %v2000_v37 = vld [vmem:[%s3620_s3 + $0x10] sm:$0xff] }
 0x117   : > { %1173 = vst.msk [vmem:[#allocation3 + $0x30] sm:$0xff] %vm1166_vm13, %v1155_v31  ;;  %2478 = vmatprep.subr.mxu1 %v2000_v37 }
 0x118   : > { %2479 = vmatpush3.msra.mxu1 %v2000_v37 }
 0x119   : > { %v1108_v38 = vpop.permute.xlu0 %1107 }
 0x11a   : > { %1125 = vst.msk [vmem:[#allocation3 + $0x38] sm:$0xff] %vm1117_vm12, %v1108_v38  ;;  %v1348_v39 = vpop.permute.xlu1 %1347 }
 0x11b   : > { %1368 = vst.msk [vmem:[#allocation3 + $0x20] sm:$0xff] %vm1363_vm1, %v1348_v39 }
 0x11d   : > { %v1301_v42 = vpop.permute.xlu0 %1300 }
 0x11e   : > { %1320 = vst.msk [vmem:[#allocation3 + $0x28] sm:$0xff] %vm1314_vm0, %v1301_v42  ;;  %v1204_v45 = vpop.permute.xlu1 %1203 }
 0x11f   : > { %1222 = vst.msk [vmem:[#allocation3 + $0x30] sm:$0xff] %vm1215_vm14, %v1204_v45  ;;  %v1999_v45 = vld [vmem:[%s3620_s3 + $0x8] sm:$0xff] }
 0x120   : > { %2480 = vmatprep.subr.mxu1 %v1999_v45 }
 0x121   : > { %v1157_v43 = vpop.permute.xlu0 %1156  ;;  %2481 = vmatpush3.msra.mxu1 %v1999_v45 }
 0x122   : > { %1174 = vst.msk [vmem:[#allocation3 + $0x38] sm:$0xff] %vm1166_vm13, %v1157_v43  ;;  %v1376_v10 = vld [vmem:[#allocation3 + $0x20] sm:$0xff]  ;;  %v1206_v44 = vpop.permute.xlu1 %1205 }
 0x123   : > { %2460 = vmatprep.mubr.msk.f32.mxu0 %vm1392_vm2, %v1376_v10  ;;  %1223 = vst.msk [vmem:[#allocation3 + $0x38] sm:$0xff] %vm1215_vm14, %v1206_v44  ;;  %v1998_v10 = vld [vmem:[%s3620_s3] sm:$0xff] }
 0x124   : > { %2482 = vmatprep.subr.mxu1 %v1998_v10 }
 0x125   : > { %v1350_v50 = vpop.permute.xlu0 %1349  ;;  %2483 = vmatpush3.msra.mxu1 %v1998_v10 }
 0x126   : > { %1369 = vst.msk [vmem:[#allocation3 + $0x28] sm:$0xff] %vm1363_vm1, %v1350_v50  ;;  %v1256_v51 = vpop.permute.xlu1 %1255 }
 0x127   : > { %1273 = vst.msk [vmem:[#allocation3 + $0x38] sm:$0xff] %vm1265_vm15, %v1256_v51 }
 0x129   : > { %v1254_v47 = vpop.permute.xlu0 %1253 }
 0x12a   : > { %1272 = vst.msk [vmem:[#allocation3 + $0x30] sm:$0xff] %vm1265_vm15, %v1254_v47  ;;  %v1305_v52 = vpop.permute.xlu1 %1304  ;;  %vm1735_vm15 = vcmask 261312  }
 0x12b   : > { %1322 = vst.msk [vmem:[#allocation3 + $0x38] sm:$0xff] %vm1314_vm0, %v1305_v52 }
 0x12d   : > { %v1377_v53 = vld [vmem:[#allocation3 + $0x28] sm:$0xff]  ;;  %v1303_v30 = vpop.permute.xlu0 %1302 }
 0x12e   : > { %2461 = vmatmul.mubr.msk.f32.gmra.mxu0 %vm1392_vm2, %v1377_v53  ;;  %1321 = vst.msk [vmem:[#allocation3 + $0x30] sm:$0xff] %vm1314_vm0, %v1303_v30  ;;  %v1354_v56 = vpop.permute.xlu1 %1353  ;;  %vm1784_vm0 = vcmask 326912  }
 0x12f   : > { %1371 = vst.msk [vmem:[#allocation3 + $0x38] sm:$0xff] %vm1363_vm1, %v1354_v56 }
 0x131   : > { %v1352_v57 = vpop.permute.xlu0 %1351 }
 0x132   : > { %1370 = vst.msk [vmem:[#allocation3 + $0x30] sm:$0xff] %vm1363_vm1, %v1352_v57  ;;  %vm1833_vm1 = vcmask 392512  }
 0x135   : > { %v1614_v46 = vpop.permute.xlu0 %1613 }
 0x136   : > { %v1379_v28 = vld [vmem:[#allocation3 + $0x38] sm:$0xff]  ;;  %1638 = vst.msk [vmem:[#allocation5] sm:$0xff] %vm1637_vm5, %v1614_v46 }
 0x139   : > { %v1378_v61 = vld [vmem:[#allocation3 + $0x30] sm:$0xff]  ;;  %v1663_v1 = vpop.permute.xlu0 %1662 }
 0x13a   : > { %2463 = vmatprep.mubr.msk.f32.mxu0 %vm1392_vm2, %v1378_v61  ;;  %1687 = vst.msk [vmem:[#allocation5] sm:$0xff] %vm1686_vm6, %v1663_v1  ;;  %v3452_v1 = vpop.permute.xlu1 %1873 }
 0x13b   : > { %2464 = vmatmul.mubr.msk.f32.gmra.mxu0 %vm1392_vm2, %v1379_v28  ;;  %vm1883_vm2 = vcmask 458112  }
 0x1ab   : > { %v2456_v2 = vpop.f32.mrf.mxu0 }
 0x1ac   : > { %v1493_v3 = vadd.f32 %v2456_v2, %v3352_v63 }
 0x1ad   : > { %v1487_v4 = vpop.f32.mrf.mxu0 }
 0x1ae   : > { %vm1527_vm7 = vcmp.gt.f32.partialorder %v1493_v3, 0.0  ;;  %v1535_v5 = vmul.f32 0.1, %v1493_v3  ;;  %v1488_v40 = vadd.f32 %v3352_v63, %v1487_v4 }
 0x1b0   : > { %v1543_v7 = vsel %vm1527_vm7, %v1493_v3, %v1535_v5  ;;  %vm1526_vm8 = vcmp.gt.f32.partialorder %v1488_v40, 0.0  ;;  %v1534_v8 = vmul.f32 0.1, %v1488_v40  ;;  %v3458_v3 = vpop.permute.xlu1 %1922  ;;  %v1948_v5 = vld [vmem:[#allocation4 + $0x92] sm:$0xff]  ;;  %vm1981_vm7 = vcmask 589312  }
 0x1b1   : > { %1574 = vst.msk [vmem:[#allocation4 + $0x21] sm:$0xff] %vm1550_vm3, %v1543_v7 }
 0x1b2   : > { %v1542_v9 = vsel %vm1526_vm8, %v1488_v40, %v1534_v8  ;;  %vm2014_vm8 = vcmask 588800  }
 0x1b3   : > { %1573 = vst.msk [vmem:[#allocation4 + $0x11] sm:$0xff] %vm1550_vm3, %v1542_v9 }
 0x1b8   : > { %v1745_v11 = vld [vmem:[#allocation4 + $0x21] sm:$0xff] }
 0x1b9   : > { %v1696_v13 = vld [vmem:[#allocation4 + $0x20] sm:$0xff]  ;;  %1762 = vrot.lane.b32.xlu0 %v1745_v11, %s2619_s17 }
 0x1ba   : > { %1713 = vrot.lane.b32.xlu1 %v1696_v13, %s2617_s15  ;;  %1591 = vst.msk [vmem:[#allocation5 + $0x10] sm:$0xff] %vm1550_vm3, %v1696_v13  ;;  %v1695_v14 = vld [vmem:[#allocation4 + $0x10] sm:$0xff]  ;;  %v1794_v15 = vld [vmem:[#allocation4 + $0x22] sm:$0xff] }
 0x1bb   : > { %1590 = vst.msk [vmem:[#allocation5 + $0x8] sm:$0xff] %vm1550_vm3, %v1695_v14  ;;  %v1744_v16 = vld [vmem:[#allocation4 + $0x11] sm:$0xff] }
 0x1bc   : > { %v1647_v49 = vld [vmem:[#allocation4 + $0x12] sm:$0xff] }
 0x1bd   : > { %1811 = vrot.lane.b32.xlu0 %v1794_v15, %s2622_s26 }
 0x1be   : > { %1617 = vrot.lane.b32.xlu1 %v1745_v11, %s2613_s11 }
 0x1c1   : > { %1711 = vrot.lane.b32.xlu0 %v1695_v14, %s2617_s15 }
 0x1c2   : > { %1666 = vrot.lane.b32.xlu1 %v1794_v15, %s2615_s13 }
 0x1c5   : > { %1760 = vrot.lane.b32.xlu0 %v1744_v16, %s2619_s17 }
 0x1c6   : > { %1859 = vrot.lane.b32.xlu1 %v1696_v13, %s2620_s10 }
 0x1ca   : > { %1908 = vrot.lane.b32.xlu1 %v1745_v11, %s2621_s12 }
 0x1cb   : > { %v2459_v41 = vpop.f32.mrf.mxu0 }
 0x1cc   : > { %v1503_v17 = vadd.f32 %v2459_v41, %v3352_v63 }
 0x1cd   : > { %v1497_v18 = vpop.f32.mrf.mxu0 }
 0x1ce   : > { %1957 = vrot.lane.b32.xlu1 %v1794_v15, %s2623_s30  ;;  %vm1529_vm9 = vcmp.gt.f32.partialorder %v1503_v17, 0.0  ;;  %v1537_v19 = vmul.f32 0.1, %v1503_v17  ;;  %v1498_v6 = vadd.f32 %v3352_v63, %v1497_v18 }
 0x1d0   : > { %v1545_v20 = vsel %vm1529_vm9, %v1503_v17, %v1537_v19  ;;  %vm1528_vm10 = vcmp.gt.f32.partialorder %v1498_v6, 0.0  ;;  %v1536_v54 = vmul.f32 0.1, %v1498_v6 }
 0x1d1   : > { %1576 = vst.msk [vmem:[#allocation4 + $0x41] sm:$0xff] %vm1550_vm3, %v1545_v20 }
 0x1d2   : > { %1615 = vrot.lane.b32.xlu1 %v1744_v16, %s2613_s11  ;;  %v1544_v21 = vsel %vm1528_vm10, %v1498_v6, %v1536_v54 }
 0x1d3   : > { %1575 = vst.msk [vmem:[#allocation4 + $0x31] sm:$0xff] %vm1550_vm3, %v1544_v21 }
 0x1d6   : > { %1664 = vrot.lane.b32.xlu1 %v1647_v49, %s2615_s13 }
 0x1d8   : > { %v1698_v22 = vld [vmem:[#allocation4 + $0x40] sm:$0xff] }
 0x1d9   : > { %1717 = vrot.lane.b32.xlu0 %v1698_v22, %s2617_s15  ;;  %1593 = vst.msk [vmem:[#allocation5 + $0x20] sm:$0xff] %vm1550_vm3, %v1698_v22  ;;  %v1601_v24 = vld [vmem:[#allocation4 + $0x41] sm:$0xff] }
 0x1da   : > { %1809 = vrot.lane.b32.xlu1 %v1647_v49, %s2622_s26  ;;  %v1844_v23 = vld [vmem:[#allocation4 + $0x30] sm:$0xff]  ;;  %v1796_v25 = vld [vmem:[#allocation4 + $0x42] sm:$0xff] }
 0x1db   : > { %1592 = vst.msk [vmem:[#allocation5 + $0x18] sm:$0xff] %vm1550_vm3, %v1844_v23  ;;  %v1600_v55 = vld [vmem:[#allocation4 + $0x31] sm:$0xff] }
 0x1dc   : > { %v1649_v29 = vld [vmem:[#allocation4 + $0x32] sm:$0xff] }
 0x1dd   : > { %1621 = vrot.lane.b32.xlu0 %v1601_v24, %s2613_s11 }
 0x1de   : > { %1766 = vrot.lane.b32.xlu1 %v1601_v24, %s2619_s17 }
 0x1e1   : > { %1815 = vrot.lane.b32.xlu0 %v1796_v25, %s2622_s26 }
 0x1e2   : > { %1670 = vrot.lane.b32.xlu1 %v1796_v25, %s2615_s13 }
 0x1e5   : > { %1619 = vrot.lane.b32.xlu0 %v1600_v55, %s2613_s11 }
 0x1e6   : > { %1863 = vrot.lane.b32.xlu1 %v1698_v22, %s2620_s10 }
 0x1e9   : > { %1668 = vrot.lane.b32.xlu0 %v1649_v29, %s2615_s13 }
 0x1ea   : > { %1912 = vrot.lane.b32.xlu1 %v1601_v24, %s2621_s12 }
 0x1ed   : > { %1861 = vrot.lane.b32.xlu0 %v1844_v23, %s2620_s10 }
 0x1ee   : > { %1961 = vrot.lane.b32.xlu1 %v1796_v25, %s2623_s30  ;;  %v2462_v12 = vpop.f32.mrf.mxu0 }
 0x1ef   : > { %v1513_v35 = vadd.f32 %v2462_v12, %v3352_v63 }
 0x1f0   : > { %v1507_v36 = vpop.f32.mrf.mxu0 }
 0x1f1   : > { %vm1531_vm11 = vcmp.gt.f32.partialorder %v1513_v35, 0.0  ;;  %v1539_v31 = vmul.f32 0.1, %v1513_v35  ;;  %v1508_v38 = vadd.f32 %v3352_v63, %v1507_v36  ;;  %1910 = vrot.lane.b32.xlu0 %v1600_v55, %s2621_s12 }
 0x1f2   : > { %1715 = vrot.lane.b32.xlu1 %v1844_v23, %s2617_s15 }
 0x1f3   : > { %v1547_v39 = vsel %vm1531_vm11, %v1513_v35, %v1539_v31  ;;  %vm1530_vm12 = vcmp.gt.f32.partialorder %v1508_v38, 0.0  ;;  %v1538_v42 = vmul.f32 0.1, %v1508_v38 }
 0x1f4   : > { %1578 = vst.msk [vmem:[#allocation4 + $0x61] sm:$0xff] %vm1550_vm3, %v1547_v39 }
 0x1f5   : > { %v1546_v43 = vsel %vm1530_vm12, %v1508_v38, %v1538_v42  ;;  %1813 = vrot.lane.b32.xlu0 %v1649_v29, %s2622_s26 }
 0x1f6   : > { %1764 = vrot.lane.b32.xlu1 %v1600_v55, %s2619_s17  ;;  %1577 = vst.msk [vmem:[#allocation4 + $0x51] sm:$0xff] %vm1550_vm3, %v1546_v43 }
 0x1fa   : > { %1959 = vrot.lane.b32.xlu1 %v1649_v29, %s2623_s30 }
 0x1fb   : > { %v1700_v44 = vld [vmem:[#allocation4 + $0x60] sm:$0xff]  ;;  %v2465_v50 = vpop.f32.mrf.mxu0 }
 0x1fc   : > { %1721 = vrot.lane.b32.xlu0 %v1700_v44, %s2617_s15  ;;  %v1603_v51 = vld [vmem:[#allocation4 + $0x61] sm:$0xff]  ;;  %v1523_v47 = vadd.f32 %v2465_v50, %v3352_v63  ;;  %1595 = vst.msk [vmem:[#allocation5 + $0x30] sm:$0xff] %vm1550_vm3, %v1700_v44 }
 0x1fd   : > { %v1517_v52 = vpop.f32.mrf.mxu0  ;;  %v1846_v53 = vld [vmem:[#allocation4 + $0x50] sm:$0xff]  ;;  %v1798_v57 = vld [vmem:[#allocation4 + $0x62] sm:$0xff] }
 0x1fe   : > { %1770 = vrot.lane.b32.xlu1 %v1603_v51, %s2619_s17  ;;  %vm1533_vm13 = vcmp.gt.f32.partialorder %v1523_v47, 0.0  ;;  %v1541_v30 = vmul.f32 0.1, %v1523_v47  ;;  %v1518_v56 = vadd.f32 %v3352_v63, %v1517_v52  ;;  %1594 = vst.msk [vmem:[#allocation5 + $0x28] sm:$0xff] %vm1550_vm3, %v1846_v53  ;;  %v1602_v60 = vld [vmem:[#allocation4 + $0x51] sm:$0xff] }
 0x1ff   : > { %v1651_v61 = vld [vmem:[#allocation4 + $0x52] sm:$0xff] }
 0x200   : > { %1625 = vrot.lane.b32.xlu0 %v1603_v51, %s2613_s11  ;;  %v1549_v58 = vsel %vm1533_vm13, %v1523_v47, %v1541_v30  ;;  %vm1532_vm14 = vcmp.gt.f32.partialorder %v1518_v56, 0.0  ;;  %v1540_v59 = vmul.f32 0.1, %v1518_v56 }
 0x201   : > { %1580 = vst.msk [vmem:[#allocation4 + $0x81] sm:$0xff] %vm1550_vm3, %v1549_v58 }
 0x202   : > { %1674 = vrot.lane.b32.xlu1 %v1798_v57, %s2615_s13  ;;  %v1548_v0 = vsel %vm1532_vm14, %v1518_v56, %v1540_v59 }
 0x203   : > { %1579 = vst.msk [vmem:[#allocation4 + $0x71] sm:$0xff] %vm1550_vm3, %v1548_v0 }
 0x204   : > { %1819 = vrot.lane.b32.xlu0 %v1798_v57, %s2622_s26 }
 0x206   : > { %1867 = vrot.lane.b32.xlu1 %v1700_v44, %s2620_s10 }
 0x208   : > { %1623 = vrot.lane.b32.xlu0 %v1602_v60, %s2613_s11  ;;  %v1702_v62 = vld [vmem:[#allocation4 + $0x80] sm:$0xff] }
 0x209   : > { %v1800_v46 = vld [vmem:[#allocation4 + $0x82] sm:$0xff] }
 0x20a   : > { %1916 = vrot.lane.b32.xlu1 %v1603_v51, %s2621_s12  ;;  %v1701_v28 = vld [vmem:[#allocation4 + $0x70] sm:$0xff]  ;;  %v1751_v63 = vld [vmem:[#allocation4 + $0x81] sm:$0xff] }
 0x20b   : > { %1596 = vst.msk [vmem:[#allocation5 + $0x38] sm:$0xff] %vm1550_vm3, %v1701_v28  ;;  %v1750_v2 = vld [vmem:[#allocation4 + $0x71] sm:$0xff] }
 0x20c   : > { %1672 = vrot.lane.b32.xlu0 %v1651_v61, %s2615_s13  ;;  %v1799_v4 = vld [vmem:[#allocation4 + $0x72] sm:$0xff] }
 0x20e   : > { %1965 = vrot.lane.b32.xlu1 %v1798_v57, %s2623_s30 }
 0x210   : > { %1865 = vrot.lane.b32.xlu0 %v1846_v53, %s2620_s10 }
 0x212   : > { %1719 = vrot.lane.b32.xlu1 %v1846_v53, %s2617_s15 }
 0x214   : > { %1914 = vrot.lane.b32.xlu0 %v1602_v60, %s2621_s12 }
 0x216   : > { %1768 = vrot.lane.b32.xlu1 %v1602_v60, %s2619_s17 }
 0x218   : > { %1817 = vrot.lane.b32.xlu0 %v1651_v61, %s2622_s26 }
 0x21a   : > { %1963 = vrot.lane.b32.xlu1 %v1651_v61, %s2623_s30 }
 0x21c   : > { %1725 = vrot.lane.b32.xlu0 %v1702_v62, %s2617_s15 }
 0x21e   : > { %1823 = vrot.lane.b32.xlu1 %v1800_v46, %s2622_s26 }
 0x220   : > { %1774 = vrot.lane.b32.xlu0 %v1751_v63, %s2619_s17 }
 0x222   : > { %1723 = vrot.lane.b32.xlu1 %v1701_v28, %s2617_s15 }
 0x224   : > { %1871 = vrot.lane.b32.xlu0 %v1702_v62, %s2620_s10 }
 0x226   : > { %1772 = vrot.lane.b32.xlu1 %v1750_v2, %s2619_s17 }
 0x228   : > { %1920 = vrot.lane.b32.xlu0 %v1751_v63, %s2621_s12 }
 0x22a   : > { %1821 = vrot.lane.b32.xlu1 %v1799_v4, %s2622_s26  ;;  %s2413_s26 = sshll.u32 %s2677_s22, 10 }
 0x22b   : > { %v1763_v40 = vpop.permute.xlu0 %1762  ;;  %s3566_s23 = scalar_lea.hbm %s3622_s5, %s2413_s26 }
 0x22c   : > { %v1714_v7 = vpop.permute.xlu1 %1713  ;;  %1627 = vrot.lane.b32.xlu0 %v1750_v2, %s2613_s11 }
 0x22e   : > { %1971 = vrot.lane.b32.xlu1 %v1948_v5, %s2623_s30 }
 0x22f   : > { %v1812_v8 = vpop.permute.xlu0 %1811 }
 0x230   : > { %v1618_v9 = vpop.permute.xlu1 %1617  ;;  %1676 = vrot.lane.b32.xlu0 %v1799_v4, %s2615_s13  ;;  %s218_s13 = sand.u32 1, %s2601_s19  }
 0x231   : > { %1640 = vst.msk [vmem:[#allocation5 + $0x10] sm:$0xff] %vm1637_vm5, %v1618_v9  ;;  %s3576_s22 = scalar_lea.sflag [#allocation7], %s218_s13 }
 0x233   : > { %v1712_v13 = vpop.permute.xlu0 %1711 }
 0x234   : > { %v1667_v11 = vpop.permute.xlu1 %1666  ;;  %1869 = vrot.lane.b32.xlu0 %v1701_v28, %s2620_s10  ;;  %1736 = vst.msk [vmem:[#allocation5] sm:$0xff] %vm1735_vm15, %v1712_v13  ;;  %s2256_s10 = sshll.u32 %s218_s13, 6 }
 0x235   : > { %1689 = vst.msk [vmem:[#allocation5 + $0x10] sm:$0xff] %vm1686_vm6, %v1667_v11 }
 0x237   : > { %v1761_v15 = vpop.permute.xlu0 %1760 }
 0x238   : > { %v1860_v14 = vpop.permute.xlu1 %1859  ;;  %1918 = vrot.lane.b32.xlu0 %v1750_v2, %s2621_s12  ;;  %1785 = vst.msk [vmem:[#allocation5] sm:$0xff] %vm1784_vm0, %v1761_v15  ;;  %s3547_s12 = scalar_lea.vmem [#allocation6], %s2256_s10 }
 0x23c   : > { %v1909_v16 = vpop.permute.xlu1 %1908  ;;  %1967 = vrot.lane.b32.xlu0 %v1799_v4, %s2623_s30 }
 0x240   : > { %v1958_v41 = vpop.permute.xlu1 %1957  ;;  %1969 = vrot.lane.b32.xlu0 %v1800_v46, %s2623_s30  ;;  %s2190_s30 = sshll.u32 %s3547_s12, 4  ;;  %s3570_s30 = int_to_ptr.vmem [resolvable:$true] %s2190_s30 }
 0x241   : > { %s2549_s25 = scalar_lea.vmem %s3570_s30, 1024  ;;  %p2556_p0 = scmp.lt.s32.totalorder %s3570_s30, %s2554_s16 }
 0x242   : > { %p2550_p11 = scmp.ne.s32.totalorder %s3570_s30, %s2549_s25  ;;  %p2557_p1 = scmp.lt.s32.totalorder %s2555_s6, %s2549_s25 }
 0x244   : > { %v1616_v17 = vpop.permute.xlu1 %1615  ;;  %p2551_p12 = pnand %p2550_p11, %p2694_p5  ;;  %p2558_p2 = por %p2557_p1, %p2556_p0 }
 0x245   : > { %1639 = vst.msk [vmem:[#allocation5 + $0x8] sm:$0xff] %vm1637_vm5, %v1616_v17 }
 0x246   : > { %p2552_p13 = pneg %p2551_p12 }
 0x248   : > { %v1665_v18 = vpop.permute.xlu1 %1664  ;;  %p2559_p3 = pnand %p2558_p2, %p2552_p13 }
 0x249   : > { %1688 = vst.msk [vmem:[#allocation5 + $0x8] sm:$0xff] %vm1686_vm6, %v1665_v18 }
 0x24a   : > { %1737 = vst.msk [vmem:[#allocation5 + $0x8] sm:$0xff] %vm1735_vm15, %v1714_v7 }
 0x24b   : > { %1786 = vst.msk [vmem:[#allocation5 + $0x8] sm:$0xff] %vm1784_vm0, %v1763_v40  ;;  %v1718_v19 = vpop.permute.xlu0 %1717 }
 0x24c   : > { %v1810_v6 = vpop.permute.xlu1 %1809  ;;  %1835 = vst.msk [vmem:[#allocation5 + $0x8] sm:$0xff] %vm1833_vm1, %v1812_v8 }
 0x24d   : > { %1834 = vst.msk [vmem:[#allocation5] sm:$0xff] %vm1833_vm1, %v1810_v6 }
 0x24e   : > { %1884 = vst.msk [vmem:[#allocation5] sm:$0xff] %vm1883_vm2, %v1860_v14 }
 0x24f   : > { %1933 = vst.msk [vmem:[#allocation5] sm:$0xff] %vm1932_vm4, %v1909_v16  ;;  %v1622_v20 = vpop.permute.xlu0 %1621 }
 0x250   : > { %1982 = vst.msk [vmem:[#allocation5] sm:$0xff] %vm1981_vm7, %v1958_v41  ;;  %v1767_v54 = vpop.permute.xlu1 %1766 }
 0x251   : > { %1642 = vst.msk [vmem:[#allocation5 + $0x20] sm:$0xff] %vm1637_vm5, %v1622_v20 }
 0x253   : > { %v1816_v21 = vpop.permute.xlu0 %1815 }
 0x254   : > { %v1671_v49 = vpop.permute.xlu1 %1670 }
 0x255   : > { %1691 = vst.msk [vmem:[#allocation5 + $0x20] sm:$0xff] %vm1686_vm6, %v1671_v49 }
 0x257   : > { %v1990_v22 = vld [vmem:[#allocation5] sm:$0xff]  ;;  %v1620_v23 = vpop.permute.xlu0 %1619 }
 0x258   : > { %2484 = vmatprep.mubr.msk.f32.mxu1 %vm2014_vm8, %v1990_v22  ;;  %v1864_v24 = vpop.permute.xlu1 %1863  ;;  %1641 = vst.msk [vmem:[#allocation5 + $0x18] sm:$0xff] %vm1637_vm5, %v1620_v23 }
 0x25b   : > { %v1669_v25 = vpop.permute.xlu0 %1668 }
 0x25c   : > { %v1913_v26 = vpop.permute.xlu1 %1912  ;;  %1690 = vst.msk [vmem:[#allocation5 + $0x18] sm:$0xff] %vm1686_vm6, %v1669_v25 }
 0x25d   : > { %1739 = vst.msk [vmem:[#allocation5 + $0x18] sm:$0xff] %vm1735_vm15, %v1718_v19 }
 0x25e   : > { %1788 = vst.msk [vmem:[#allocation5 + $0x18] sm:$0xff] %vm1784_vm0, %v1767_v54 }
 0x25f   : > { %1837 = vst.msk [vmem:[#allocation5 + $0x18] sm:$0xff] %vm1833_vm1, %v1816_v21  ;;  %v1862_v55 = vpop.permute.xlu0 %1861 }
 0x260   : > { %v1962_v27 = vpop.permute.xlu1 %1961  ;;  %1885 = vst.msk [vmem:[#allocation5 + $0x8] sm:$0xff] %vm1883_vm2, %v1862_v55 }
 0x263   : > { %v1911_v48 = vpop.permute.xlu0 %1910 }
 0x264   : > { %v1716_v29 = vpop.permute.xlu1 %1715  ;;  %1934 = vst.msk [vmem:[#allocation5 + $0x8] sm:$0xff] %vm1932_vm4, %v1911_v48 }
 0x265   : > { %1738 = vst.msk [vmem:[#allocation5 + $0x10] sm:$0xff] %vm1735_vm15, %v1716_v29 }
 0x267   : > { %v1814_v32 = vpop.permute.xlu0 %1813 }
 0x268   : > { %v1765_v33 = vpop.permute.xlu1 %1764 }
 0x269   : > { %1787 = vst.msk [vmem:[#allocation5 + $0x10] sm:$0xff] %vm1784_vm0, %v1765_v33 }
 0x26a   : > { %1836 = vst.msk [vmem:[#allocation5 + $0x10] sm:$0xff] %vm1833_vm1, %v1814_v32 }
 0x26b   : > { %1886 = vst.msk [vmem:[#allocation5 + $0x10] sm:$0xff] %vm1883_vm2, %v1864_v24 }
 0x26c   : > { %1935 = vst.msk [vmem:[#allocation5 + $0x10] sm:$0xff] %vm1932_vm4, %v1913_v26  ;;  %v1960_v12 = vpop.permute.xlu1 %1959 }
 0x26d   : > { %1984 = vst.msk [vmem:[#allocation5 + $0x10] sm:$0xff] %vm1981_vm7, %v1962_v27  ;;  %1983 = vst.msk [vmem:[#allocation5 + $0x8] sm:$0xff] %vm1981_vm7, %v1960_v12 }
 0x26e   : > { %v1722_v34 = vpop.permute.xlu0 %1721 }
 0x270   : > { %v1771_v35 = vpop.permute.xlu1 %1770 }
 0x272   : > { %v1626_v36 = vpop.permute.xlu0 %1625 }
 0x273   : > { %1644 = vst.msk [vmem:[#allocation5 + $0x30] sm:$0xff] %vm1637_vm5, %v1626_v36 }
 0x274   : > { %v1675_v37 = vpop.permute.xlu1 %1674  ;;  %v1991_v31 = vld [vmem:[#allocation5 + $0x8] sm:$0xff]  ;;  %v1992_v38 = vld [vmem:[#allocation5 + $0x10] sm:$0xff] }
 0x275   : > { %1693 = vst.msk [vmem:[#allocation5 + $0x30] sm:$0xff] %vm1686_vm6, %v1675_v37  ;;  %2485 = vmatmul.mubr.msk.f32.vlgmr.msra.gmra.mxu1 %vm2014_vm8, %v1991_v31 }
 0x276   : > { %2487 = vmatprep.mubr.msk.f32.mxu1 %vm2014_vm8, %v1992_v38  ;;  %v1820_v39 = vpop.permute.xlu0 %1819 }
 0x278   : > { %v1868_v42 = vpop.permute.xlu1 %1867 }
 0x27a   : > { %v1624_v45 = vpop.permute.xlu0 %1623 }
 0x27b   : > { %1643 = vst.msk [vmem:[#allocation5 + $0x28] sm:$0xff] %vm1637_vm5, %v1624_v45 }
 0x27c   : > { %v1917_v43 = vpop.permute.xlu1 %1916 }
 0x27e   : > { %v1673_v10 = vpop.permute.xlu0 %1672 }
 0x27f   : > { %1692 = vst.msk [vmem:[#allocation5 + $0x28] sm:$0xff] %vm1686_vm6, %v1673_v10 }
 0x280   : > { %v1966_v44 = vpop.permute.xlu1 %1965  ;;  %1741 = vst.msk [vmem:[#allocation5 + $0x28] sm:$0xff] %vm1735_vm15, %v1722_v34 }
 0x281   : > { %1790 = vst.msk [vmem:[#allocation5 + $0x28] sm:$0xff] %vm1784_vm0, %v1771_v35 }
 0x282   : > { %1839 = vst.msk [vmem:[#allocation5 + $0x28] sm:$0xff] %vm1833_vm1, %v1820_v39  ;;  %v1866_v50 = vpop.permute.xlu0 %1865 }
 0x283   : > { %1887 = vst.msk [vmem:[#allocation5 + $0x18] sm:$0xff] %vm1883_vm2, %v1866_v50 }
 0x284   : > { %v1720_v51 = vpop.permute.xlu1 %1719 }
 0x285   : > { %1740 = vst.msk [vmem:[#allocation5 + $0x20] sm:$0xff] %vm1735_vm15, %v1720_v51 }
 0x286   : > { %v1915_v47 = vpop.permute.xlu0 %1914 }
 0x287   : > { %1936 = vst.msk [vmem:[#allocation5 + $0x18] sm:$0xff] %vm1932_vm4, %v1915_v47 }
 0x288   : > { %v1769_v52 = vpop.permute.xlu1 %1768 }
 0x289   : > { %1789 = vst.msk [vmem:[#allocation5 + $0x20] sm:$0xff] %vm1784_vm0, %v1769_v52 }
 0x28a   : > { %v1818_v53 = vpop.permute.xlu0 %1817 }
 0x28b   : > { %1838 = vst.msk [vmem:[#allocation5 + $0x20] sm:$0xff] %vm1833_vm1, %v1818_v53 }
 0x28c   : > { %v1964_v30 = vpop.permute.xlu1 %1963  ;;  %1888 = vst.msk [vmem:[#allocation5 + $0x20] sm:$0xff] %vm1883_vm2, %v1868_v42 }
 0x28d   : > { %1985 = vst.msk [vmem:[#allocation5 + $0x18] sm:$0xff] %vm1981_vm7, %v1964_v30 }
 0x28e   : > { %1937 = vst.msk [vmem:[#allocation5 + $0x20] sm:$0xff] %vm1932_vm4, %v1917_v43  ;;  %v1726_v56 = vpop.permute.xlu0 %1725 }
 0x28f   : > { %1986 = vst.msk [vmem:[#allocation5 + $0x20] sm:$0xff] %vm1981_vm7, %v1966_v44 }
 0x290   : > { %v1824_v57 = vpop.permute.xlu1 %1823 }
 0x292   : > { %v1775_v58 = vpop.permute.xlu0 %1774 }
 0x294   : > { %v1724_v59 = vpop.permute.xlu1 %1723  ;;  %v1993_v0 = vld [vmem:[#allocation5 + $0x18] sm:$0xff] }
 0x295   : > { %1742 = vst.msk [vmem:[#allocation5 + $0x30] sm:$0xff] %vm1735_vm15, %v1724_v59  ;;  %2488 = vmatmul.mubr.msk.f32.gmra.mxu1 %vm2014_vm8, %v1993_v0 }
 0x296   : > { %v1994_v60 = vld [vmem:[#allocation5 + $0x20] sm:$0xff]  ;;  %v1872_v28 = vpop.permute.xlu0 %1871 }
 0x297   : > { %2490 = vmatprep.mubr.msk.f32.mxu1 %vm2014_vm8, %v1994_v60 }
 0x298   : > { %v1773_v61 = vpop.permute.xlu1 %1772 }
 0x299   : > { %1791 = vst.msk [vmem:[#allocation5 + $0x30] sm:$0xff] %vm1784_vm0, %v1773_v61 }
 0x29a   : > { %v1921_v62 = vpop.permute.xlu0 %1920 }
 0x29c   : > { %v1822_v46 = vpop.permute.xlu1 %1821 }
 0x29d   : > { %1840 = vst.msk [vmem:[#allocation5 + $0x30] sm:$0xff] %vm1833_vm1, %v1822_v46 }
 0x29e   : > { %1890 = vst.msk [vmem:[#allocation5 + $0x30] sm:$0xff] %vm1883_vm2, %v1872_v28  ;;  %v1628_v63 = vpop.permute.xlu0 %1627 }
 0x29f   : > { %1939 = vst.msk [vmem:[#allocation5 + $0x30] sm:$0xff] %vm1932_vm4, %v1921_v62 }
 0x2a0   : > { %1645 = vst.msk [vmem:[#allocation5 + $0x38] sm:$0xff] %vm1637_vm5, %v1628_v63  ;;  %v1972_v5 = vpop.permute.xlu1 %1971 }
 0x2a2   : > { %v1677_v2 = vpop.permute.xlu0 %1676 }
 0x2a3   : > { %1694 = vst.msk [vmem:[#allocation5 + $0x38] sm:$0xff] %vm1686_vm6, %v1677_v2 }
 0x2a4   : > { %1743 = vst.msk [vmem:[#allocation5 + $0x38] sm:$0xff] %vm1735_vm15, %v1726_v56 }
 0x2a5   : > { %1792 = vst.msk [vmem:[#allocation5 + $0x38] sm:$0xff] %vm1784_vm0, %v1775_v58 }
 0x2a6   : > { %1841 = vst.msk [vmem:[#allocation5 + $0x38] sm:$0xff] %vm1833_vm1, %v1824_v57  ;;  %v1870_v4 = vpop.permute.xlu0 %1869 }
 0x2a7   : > { %1889 = vst.msk [vmem:[#allocation5 + $0x28] sm:$0xff] %vm1883_vm2, %v1870_v4  ;;  %1891 = vst.msk [vmem:[#allocation5 + $0x38] sm:$0xff] %vm1883_vm2, %v3452_v1 }
 0x2a8   : > { %1940 = vst.msk [vmem:[#allocation5 + $0x38] sm:$0xff] %vm1932_vm4, %v3458_v3  ;;  %v2398_v3 = vld [vmem:[%s3621_s4] ss:$0 sm:$0xff] }
 0x2a9   : > { %1989 = vst.msk [vmem:[#allocation5 + $0x38] sm:$0xff] %vm1981_vm7, %v1972_v5 }
 0x2aa   : > { %v1919_v40 = vpop.permute.xlu0 %1918 }
 0x2ab   : > { %1938 = vst.msk [vmem:[#allocation5 + $0x28] sm:$0xff] %vm1932_vm4, %v1919_v40 }
 0x2ae   : > { %v1968_v7 = vpop.permute.xlu0 %1967 }
 0x2af   : > { %1987 = vst.msk [vmem:[#allocation5 + $0x28] sm:$0xff] %vm1981_vm7, %v1968_v7 }
 0x2b0   : > { %v1997_v11 = vld [vmem:[#allocation5 + $0x38] sm:$0xff] }
 0x2b2   : > { %v1970_v8 = vpop.permute.xlu0 %1969 }
 0x2b3   : > { %1988 = vst.msk [vmem:[#allocation5 + $0x30] sm:$0xff] %vm1981_vm7, %v1970_v8 }
 0x2b6   : > { %v1995_v9 = vld [vmem:[#allocation5 + $0x28] sm:$0xff] }
 0x2b7   : > { %2491 = vmatmul.mubr.msk.f32.gmra.mxu1 %vm2014_vm8, %v1995_v9 }
 0x2ba   : > { %v1996_v1 = vld [vmem:[#allocation5 + $0x30] sm:$0xff] }
 0x2bb   : > { %2493 = vmatprep.mubr.msk.f32.mxu1 %vm2014_vm8, %v1996_v1 }
 0x2bc   : > { %2494 = vmatmul.mubr.msk.f32.gmra.mxu1 %vm2014_vm8, %v1997_v11 }
 0x335   : > { %v2486_v13 = vpop.f32.mrf.mxu1 }
 0x336   : > { %v2111_v14 = vadd.f32 %v2486_v13, %v2398_v3 }
 0x337   : > { %v2105_v15 = vpop.f32.mrf.mxu1 }
 0x338   : > { %vm2145_vm5 = vcmp.gt.f32.partialorder %v2111_v14, 0.0  ;;  %v2153_v16 = vmul.f32 0.1, %v2111_v14  ;;  %v2106_v41 = vadd.f32 %v2398_v3, %v2105_v15 }
 0x33a   : > { %v2161_v17 = vsel %vm2145_vm5, %v2111_v14, %v2153_v16  ;;  %vm2144_vm6 = vcmp.gt.f32.partialorder %v2106_v41, 0.0  ;;  %v2152_v18 = vmul.f32 0.1, %v2106_v41 }
 0x33b   : > { %2169 = vst.msk [vmem:[%s3547_s12 + $0x8] sm:$0xff] %vm1550_vm3, %v2161_v17 }
 0x33c   : > { %v2160_v19 = vsel %vm2144_vm6, %v2106_v41, %v2152_v18 }
 0x33d   : > { %2168 = vst.msk [vmem:[%s3547_s12] sm:$0xff] %vm1550_vm3, %v2160_v19 }
 0x355   : > { %v2489_v6 = vpop.f32.mrf.mxu1 }
 0x356   : > { %v2121_v20 = vadd.f32 %v2489_v6, %v2398_v3 }
 0x357   : > { %v2115_v54 = vpop.f32.mrf.mxu1 }
 0x358   : > { %vm2147_vm9 = vcmp.gt.f32.partialorder %v2121_v20, 0.0  ;;  %v2155_v21 = vmul.f32 0.1, %v2121_v20  ;;  %v2116_v49 = vadd.f32 %v2398_v3, %v2115_v54 }
 0x35a   : > { %v2163_v22 = vsel %vm2147_vm9, %v2121_v20, %v2155_v21  ;;  %vm2146_vm10 = vcmp.gt.f32.partialorder %v2116_v49, 0.0  ;;  %v2154_v23 = vmul.f32 0.1, %v2116_v49 }
 0x35b   : > { %2171 = vst.msk [vmem:[%s3547_s12 + $0x18] sm:$0xff] %vm1550_vm3, %v2163_v22 }
 0x35c   : > { %v2162_v24 = vsel %vm2146_vm10, %v2116_v49, %v2154_v23 }
 0x35d   : > { %2170 = vst.msk [vmem:[%s3547_s12 + $0x10] sm:$0xff] %vm1550_vm3, %v2162_v24 }
 0x377   : > { %v2492_v25 = vpop.f32.mrf.mxu1 }
 0x378   : > { %v2131_v26 = vadd.f32 %v2492_v25, %v2398_v3 }
 0x379   : > { %v2125_v55 = vpop.f32.mrf.mxu1 }
 0x37a   : > { %vm2149_vm11 = vcmp.gt.f32.partialorder %v2131_v26, 0.0  ;;  %v2157_v27 = vmul.f32 0.1, %v2131_v26  ;;  %v2126_v48 = vadd.f32 %v2398_v3, %v2125_v55 }
 0x37c   : > { %v2165_v29 = vsel %vm2149_vm11, %v2131_v26, %v2157_v27  ;;  %vm2148_vm12 = vcmp.gt.f32.partialorder %v2126_v48, 0.0  ;;  %v2156_v32 = vmul.f32 0.1, %v2126_v48  ;;  %v2495_v33 = vpop.f32.mrf.mxu1 }
 0x37d   : > { %2173 = vst.msk [vmem:[%s3547_s12 + $0x28] sm:$0xff] %vm1550_vm3, %v2165_v29  ;;  %v2141_v12 = vadd.f32 %v2495_v33, %v2398_v3 }
 0x37e   : > { %v2164_v34 = vsel %vm2148_vm12, %v2126_v48, %v2156_v32  ;;  %v2135_v35 = vpop.f32.mrf.mxu1 }
 0x37f   : > { %2172 = vst.msk [vmem:[%s3547_s12 + $0x20] sm:$0xff] %vm1550_vm3, %v2164_v34  ;;  %vm2151_vm13 = vcmp.gt.f32.partialorder %v2141_v12, 0.0  ;;  %v2159_v36 = vmul.f32 0.1, %v2141_v12  ;;  %v2136_v37 = vadd.f32 %v2398_v3, %v2135_v35 }
 0x381   : > { %v2167_v31 = vsel %vm2151_vm13, %v2141_v12, %v2159_v36  ;;  %vm2150_vm14 = vcmp.gt.f32.partialorder %v2136_v37, 0.0  ;;  %v2158_v38 = vmul.f32 0.1, %v2136_v37 }
 0x382   : > { %2175 = vst.msk [vmem:[%s3547_s12 + $0x38] sm:$0xff] %vm1550_vm3, %v2167_v31 }
 0x383   : > { %v2166_v39 = vsel %vm2150_vm14, %v2136_v37, %v2158_v38 }
 0x384   : > { %2174 = vst.msk [vmem:[%s3547_s12 + $0x30] sm:$0xff] %vm1550_vm3, %v2166_v39 }
 0x385   : > { %2562 = shalt.err (!%p2559_p3)
}
 0x386   : > { %s2563_s7 = scalar_lea.hbm %s3566_s23, 1024  ;;  %s2567_s17 = scalar_lea.hbm %s3622_s5, 2048 }
 0x387   : > { %p2564_p4 = scmp.ne.s32.totalorder %s3566_s23, %s2563_s7  ;;  %p2568_p9 = scmp.lt.s32.totalorder %s3566_s23, %s3622_s5 }
 0x388   : > { %p2569_p10 = scmp.lt.s32.totalorder %s2567_s17, %s2563_s7 }
 0x389   : > { %p2565_p7 = pnand %p2564_p4, %p2694_p5 }
 0x38a   : > { %p2570_p11 = por %p2569_p10, %p2568_p9 }
 0x38b   : > { %p2566_p8 = pneg %p2565_p7 }
 0x38d   : > { %p2571_p12 = pnand %p2570_p11, %p2566_p8 }
 0x38f   : > { %2574 = shalt.err (!%p2571_p12)
}
 0x390   : > { %s2625_s26 = smov 128  }
 0x391   : > { %2496 = dma.vmem_to_hbm [thread:$0]  (%p2694_p5), %s3570_s30, 1024, %s3566_s23, %s3576_s22, %s2625_s26, %s2625_s26, %s2613_s11  }
 0x392 PF: > { %p2502_p13 = scmp.ge.s32.totalorder %s2609_s21, 2  ;;  %s2205_s8 = sand.u32 1, %s2597_s18  }
 0x393   : > { %s2206_s9 = scalar_lea.sflag [#allocation7], %s2205_s8 }
 0x394   : > { %p2499_p0 = pnand %p2502_p13, %p2698_p6 }
 0x396   : > { %p2500_p1 = pneg %p2499_p0 }
 0x398   : > { %2592 = dma.done.wait (%p2500_p1), %s2206_s9, 1024  }
 0x399   : > { %2594 = vsyncadd (%p2500_p1), %s2206_s9, 4294966272  ;;  %p15_p2 = scmp.ge.s32.totalorder %s2681_s24, 4   ;;  %s3625_s18 = smov %s2601_s19 }
 0x39a   : > { %s3626_s19 = smov %s2605_s20  ;;  %s3627_s20 = smov %s2692_s27 }
 0x39b   : > { %s3628_s21 = smov %s2681_s24  ;;  %17 = sbr.rel (!%p15_p2) target bundleno = 3 (0x3), region = 80 }
 0x3a0   :  { %2211 = vsyncpa [#allocation7], 1 }
 0x3a1   :  { %2213 = vsyncpa [#allocation7 + $0x1], 1 }

</bundles_post_ra>
